<compile_context>
chip_gen: v6e
topology: v6e:2x2x1
jax: 0.10.0
libtpu: 0.0.40
codegen_flags: <defaults>
</compile_context>

<pallas_src>
import jax
import jax.numpy as jnp
from jax import lax
from jax.experimental import pallas as pl
from jax.experimental.pallas import tpu as pltpu


# ------------------------------ fused kernel ------------------------------- #

def _down_step_fused_kernel(x_ref, w1_ref, b1_ref, w2_ref, b2_ref, o_ref,
                            pad1, pad2):
    # x_ref : (1, H, W, Cin)        NHWC input tile (one image)
    # w1_ref: (3, 3, Cin, Cout)     HWIO weights, conv1
    # b1_ref: (1, Cout)
    # w2_ref: (3, 3, Cout, Cout)    HWIO weights, conv2
    # b2_ref: (1, Cout)
    # o_ref : (1, Hh, Wh, Cout)     NHWC output tile (Hh=H//2, Wh=W//2)
    # pad1  : VMEM (Hh+2, Wh+2, Cin)   zero-padded pooled activation
    # pad2  : VMEM (Hh+2, Wh+2, Cout)  zero-padded conv1 activation
    _, H, W, Cin = x_ref.shape
    _, Hh, Wh, Cout = o_ref.shape
    HW = Hh * Wh

    # Zero the padded scratch each grid step (borders must be 0; cheap, and safe
    # under megacore sharding where program_id==0 may never run on a given core).
    pad1[...] = jnp.zeros_like(pad1)
    pad2[...] = jnp.zeros_like(pad2)

    # --- MaxPool2d(2), written straight into the padded scratch interior -----
    x = x_ref[0].reshape(Hh, 2, Wh, 2, Cin)
    pad1[1:Hh + 1, 1:Wh + 1, :] = jnp.max(x, axis=(1, 3))

    # --- conv1: 3x3 SAME + ReLU (bias folded into accumulator init) ----------
    acc = jnp.broadcast_to(b1_ref[...], (HW, Cout)).astype(jnp.float32)
    for dy in range(3):
        for dx in range(3):
            patch = pad1[dy:dy + Hh, dx:dx + Wh, :].reshape(HW, Cin)
            acc = acc + jnp.dot(patch, w1_ref[dy, dx],
                                preferred_element_type=jnp.float32)
    pad2[1:Hh + 1, 1:Wh + 1, :] = jnp.maximum(acc, 0.0).reshape(Hh, Wh, Cout)

    # --- conv2: 3x3 SAME + ReLU ----------------------------------------------
    acc = jnp.broadcast_to(b2_ref[...], (HW, Cout)).astype(jnp.float32)
    for dy in range(3):
        for dx in range(3):
            patch = pad2[dy:dy + Hh, dx:dx + Wh, :].reshape(HW, Cout)
            acc = acc + jnp.dot(patch, w2_ref[dy, dx],
                                preferred_element_type=jnp.float32)
    o_ref[...] = jnp.maximum(acc, 0.0).reshape(1, Hh, Wh, Cout).astype(o_ref.dtype)


# -------------------------------- wrappers --------------------------------- #

def down_step_nhwc(x_nhwc, params):
    """Fused downStep on NHWC input -> NHWC output (single pallas_call)."""
    (w1, b1), (w2, b2) = params          # weights already HWIO
    N, H, W, Cin = x_nhwc.shape
    Cout = w1.shape[-1]
    Hh, Wh = H // 2, W // 2
    b1r = b1.reshape(1, Cout)
    b2r = b2.reshape(1, Cout)

    return pl.pallas_call(
        _down_step_fused_kernel,
        out_shape=jax.ShapeDtypeStruct((N, Hh, Wh, Cout), x_nhwc.dtype),
        grid=(N,),
        in_specs=[
            pl.BlockSpec((1, H, W, Cin), lambda n: (n, 0, 0, 0)),
            pl.BlockSpec((3, 3, Cin, Cout), lambda n: (0, 0, 0, 0)),
            pl.BlockSpec((1, Cout), lambda n: (0, 0)),
            pl.BlockSpec((3, 3, Cout, Cout), lambda n: (0, 0, 0, 0)),
            pl.BlockSpec((1, Cout), lambda n: (0, 0)),
        ],
        out_specs=pl.BlockSpec((1, Hh, Wh, Cout), lambda n: (n, 0, 0, 0)),
        scratch_shapes=[
            pltpu.VMEM((Hh + 2, Wh + 2, Cin), jnp.float32),
            pltpu.VMEM((Hh + 2, Wh + 2, Cout), jnp.float32),
        ],
        compiler_params=pltpu.CompilerParams(
            dimension_semantics=("parallel",),        # batch across TCs on v7x
            vmem_limit_bytes=32 * 1024 * 1024,
        ),
    )(x_nhwc, w1, b1r, w2, b2r)


def down_step(x_nchw, params):
    """PyTorch-parity entry point (NCHW in/out).

    The transposes below are only an interface shim for NCHW parity; a full
    UNet built on these kernels would stay NHWC end-to-end and call
    down_step_nhwc directly (saves 2 full HBM passes per block)."""
    x = jnp.transpose(x_nchw, (0, 2, 3, 1))           # NCHW -> NHWC
    y = down_step_nhwc(x, params)
    return jnp.transpose(y, (0, 3, 1, 2))             # NHWC -> NCHW


def init_params(key, inC, outC):
    k1, k2, k3, k4 = jax.random.split(key, 4)
    # Conv2d default init: U(-s, s), s = 1/sqrt(fan_in), fan_in = C*3*3
    s1 = 1.0 / jnp.sqrt(inC * 9.0)
    s2 = 1.0 / jnp.sqrt(outC * 9.0)
    w1 = jax.random.uniform(k1, (3, 3, inC, outC), jnp.float32, -s1, s1)
    b1 = jax.random.uniform(k2, (outC,), jnp.float32, -s1, s1)
    w2 = jax.random.uniform(k3, (3, 3, outC, outC), jnp.float32, -s2, s2)
    b2 = jax.random.uniform(k4, (outC,), jnp.float32, -s2, s2)
    return (w1, b1), (w2, b2)


# -------------------------------- reference -------------------------------- #

def down_step_ref(x_nchw, params):
    (w1, b1), (w2, b2) = params
    x = lax.reduce_window(x_nchw, -jnp.inf, lax.max,
                          (1, 1, 2, 2), (1, 1, 2, 2), "VALID")

    def conv(x, w_hwio, b):
        y = lax.conv_general_dilated(
            x, w_hwio, window_strides=(1, 1), padding="SAME",
            dimension_numbers=("NCHW", "HWIO", "NCHW"))
        return jnp.maximum(y + b.reshape(1, -1, 1, 1), 0.0)

    return conv(conv(x, w1, b1), w2, b2)


# ----------------------------------- main ----------------------------------- #

if __name__ == "__main__":
    key = jax.random.PRNGKey(0)
    kx, kp = jax.random.split(key)

    N, inC, H, W = 2, 4, 16, 16
    outC = 8
    x = jax.random.normal(kx, (N, inC, H, W), dtype=jnp.float32)
    params = init_params(kp, inC, outC)

    out = down_step(x, params)
    out = jax.block_until_ready(out)

    ref = down_step_ref(x, params)
    assert out.shape == (N, outC, H // 2, W // 2), out.shape
    assert jnp.allclose(out, ref, atol=1e-4, rtol=1e-4), "mismatch vs reference"

    print("KERNEL_OK")
</pallas_src>

<mosaic_0001>
module attributes {stable_mosaic.version = 11 : i64} {
  func.func @_down_step_fused_kernel(%arg0: i32, %arg1: memref<1x16x16x4xf32, #tpu.memory_space<vmem>>, %arg2: memref<3x3x4x8xf32, #tpu.memory_space<vmem>>, %arg3: memref<1x8xf32, #tpu.memory_space<vmem>>, %arg4: memref<3x3x8x8xf32, #tpu.memory_space<vmem>>, %arg5: memref<1x8xf32, #tpu.memory_space<vmem>>, %arg6: memref<1x8x8x8xf32, #tpu.memory_space<vmem>>, %arg7: memref<10x10x4xf32, #tpu.memory_space<vmem>>, %arg8: memref<10x10x8xf32, #tpu.memory_space<vmem>>) attributes {dimension_semantics = [#tpu.dimension_semantics<parallel>], iteration_bounds = array<i64: 2>, scalar_prefetch = 0 : i64, scratch_operands = 2 : i64, tpu.core_type = #tpu.core_type<tc>, window_params = [{transform_indices = @transform_0, window_bounds = array<i64: 1, 16, 16, 4>}, {pipeline_mode = #tpu.pipeline_mode<synchronous>, transform_indices = @transform_1, window_bounds = array<i64: 3, 3, 4, 8>}, {pipeline_mode = #tpu.pipeline_mode<synchronous>, transform_indices = @transform_2, window_bounds = array<i64: 1, 8>}, {pipeline_mode = #tpu.pipeline_mode<synchronous>, transform_indices = @transform_3, window_bounds = array<i64: 3, 3, 8, 8>}, {pipeline_mode = #tpu.pipeline_mode<synchronous>, transform_indices = @transform_4, window_bounds = array<i64: 1, 8>}, {transform_indices = @transform_5, window_bounds = array<i64: 1, 8, 8, 8>}]} {
    %cst = arith.constant 0.000000e+00 : f32
    %0 = vector.broadcast %cst : f32 to vector<10x10x4xf32>
    %c0 = arith.constant 0 : index
    %c0_0 = arith.constant 0 : index
    %c0_1 = arith.constant 0 : index
    %1 = vector.load %arg7[%c0, %c0_0, %c0_1] : memref<10x10x4xf32, #tpu.memory_space<vmem>>, vector<10x10x4xf32>
    tpu.vector_store %arg7[%c0, %c0_0, %c0_1], %0 {strides = array<i32>} : memref<10x10x4xf32, #tpu.memory_space<vmem>>, vector<10x10x4xf32>,
    %cst_2 = arith.constant 0.000000e+00 : f32
    %2 = vector.broadcast %cst_2 : f32 to vector<10x10x8xf32>
    %c0_3 = arith.constant 0 : index
    %c0_4 = arith.constant 0 : index
    %c0_5 = arith.constant 0 : index
    %3 = vector.load %arg8[%c0_3, %c0_4, %c0_5] : memref<10x10x8xf32, #tpu.memory_space<vmem>>, vector<10x10x8xf32>
    tpu.vector_store %arg8[%c0_3, %c0_4, %c0_5], %2 {strides = array<i32>} : memref<10x10x8xf32, #tpu.memory_space<vmem>>, vector<10x10x8xf32>,
    %c0_6 = arith.constant 0 : index
    %c0_7 = arith.constant 0 : index
    %c0_8 = arith.constant 0 : index
    %c0_9 = arith.constant 0 : index
    %4 = vector.load %arg1[%c0_6, %c0_7, %c0_8, %c0_9] : memref<1x16x16x4xf32, #tpu.memory_space<vmem>>, vector<1x16x16x4xf32>
    %5 = vector.shape_cast %4 : vector<1x16x16x4xf32> to vector<16x16x4xf32>
    %6 = vector.shape_cast %5 : vector<16x16x4xf32> to vector<8x2x8x2x4xf32>
    %cst_10 = arith.constant dense<0xFF800000> : vector<8x8x4xf32>
    %7 = vector.multi_reduction <maximumf>, %6, %cst_10 [1, 3] : vector<8x2x8x2x4xf32> to vector<8x8x4xf32>
    %c1 = arith.constant 1 : index
    %c1_11 = arith.constant 1 : index
    %c0_12 = arith.constant 0 : index
    %8 = vector.load %arg7[%c1, %c1_11, %c0_12] : memref<10x10x4xf32, #tpu.memory_space<vmem>>, vector<8x8x4xf32>
    tpu.vector_store %arg7[%c1, %c1_11, %c0_12], %7 {strides = array<i32>} : memref<10x10x4xf32, #tpu.memory_space<vmem>>, vector<8x8x4xf32>,
    %c0_13 = arith.constant 0 : index
    %c0_14 = arith.constant 0 : index
    %9 = vector.load %arg3[%c0_13, %c0_14] : memref<1x8xf32, #tpu.memory_space<vmem>>, vector<1x8xf32>
    %10 = vector.shape_cast %9 : vector<1x8xf32> to vector<1x8xf32>
    %11 = vector.broadcast %10 : vector<1x8xf32> to vector<64x8xf32>
    %c0_15 = arith.constant 0 : index
    %c0_16 = arith.constant 0 : index
    %c0_17 = arith.constant 0 : index
    %12 = vector.load %arg7[%c0_15, %c0_16, %c0_17] : memref<10x10x4xf32, #tpu.memory_space<vmem>>, vector<8x8x4xf32>
    %13 = vector.shape_cast %12 : vector<8x8x4xf32> to vector<64x4xf32>
    %c0_18 = arith.constant 0 : index
    %c0_19 = arith.constant 0 : index
    %c0_20 = arith.constant 0 : index
    %c0_21 = arith.constant 0 : index
    %14 = vector.load %arg2[%c0_18, %c0_19, %c0_20, %c0_21] : memref<3x3x4x8xf32, #tpu.memory_space<vmem>>, vector<1x1x4x8xf32>
    %15 = vector.shape_cast %14 : vector<1x1x4x8xf32> to vector<4x8xf32>
    %cst_22 = arith.constant dense<0.000000e+00> : vector<64x8xf32>
    %16 = tpu.matmul %13, %15, %cst_22 {dimension_numbers = #tpu.dot_dimension_numbers<[1], [0], [0], [1], [0, 0, 1, 1], [], []>} : vector<64x4xf32>, vector<4x8xf32>, vector<64x8xf32> -> vector<64x8xf32>
    %17 = arith.addf %11, %16 : vector<64x8xf32>
    %c0_23 = arith.constant 0 : index
    %c1_24 = arith.constant 1 : index
    %c0_25 = arith.constant 0 : index
    %18 = vector.load %arg7[%c0_23, %c1_24, %c0_25] : memref<10x10x4xf32, #tpu.memory_space<vmem>>, vector<8x8x4xf32>
    %19 = vector.shape_cast %18 : vector<8x8x4xf32> to vector<64x4xf32>
    %c0_26 = arith.constant 0 : index
    %c1_27 = arith.constant 1 : index
    %c0_28 = arith.constant 0 : index
    %c0_29 = arith.constant 0 : index
    %20 = vector.load %arg2[%c0_26, %c1_27, %c0_28, %c0_29] : memref<3x3x4x8xf32, #tpu.memory_space<vmem>>, vector<1x1x4x8xf32>
    %21 = vector.shape_cast %20 : vector<1x1x4x8xf32> to vector<4x8xf32>
    %cst_30 = arith.constant dense<0.000000e+00> : vector<64x8xf32>
    %22 = tpu.matmul %19, %21, %cst_30 {dimension_numbers = #tpu.dot_dimension_numbers<[1], [0], [0], [1], [0, 0, 1, 1], [], []>} : vector<64x4xf32>, vector<4x8xf32>, vector<64x8xf32> -> vector<64x8xf32>
    %23 = arith.addf %17, %22 : vector<64x8xf32>
    %c0_31 = arith.constant 0 : index
    %c2 = arith.constant 2 : index
    %c0_32 = arith.constant 0 : index
    %24 = vector.load %arg7[%c0_31, %c2, %c0_32] : memref<10x10x4xf32, #tpu.memory_space<vmem>>, vector<8x8x4xf32>
    %25 = vector.shape_cast %24 : vector<8x8x4xf32> to vector<64x4xf32>
    %c0_33 = arith.constant 0 : index
    %c2_34 = arith.constant 2 : index
    %c0_35 = arith.constant 0 : index
    %c0_36 = arith.constant 0 : index
    %26 = vector.load %arg2[%c0_33, %c2_34, %c0_35, %c0_36] : memref<3x3x4x8xf32, #tpu.memory_space<vmem>>, vector<1x1x4x8xf32>
    %27 = vector.shape_cast %26 : vector<1x1x4x8xf32> to vector<4x8xf32>
    %cst_37 = arith.constant dense<0.000000e+00> : vector<64x8xf32>
    %28 = tpu.matmul %25, %27, %cst_37 {dimension_numbers = #tpu.dot_dimension_numbers<[1], [0], [0], [1], [0, 0, 1, 1], [], []>} : vector<64x4xf32>, vector<4x8xf32>, vector<64x8xf32> -> vector<64x8xf32>
    %29 = arith.addf %23, %28 : vector<64x8xf32>
    %c1_38 = arith.constant 1 : index
    %c0_39 = arith.constant 0 : index
    %c0_40 = arith.constant 0 : index
    %30 = vector.load %arg7[%c1_38, %c0_39, %c0_40] : memref<10x10x4xf32, #tpu.memory_space<vmem>>, vector<8x8x4xf32>
    %31 = vector.shape_cast %30 : vector<8x8x4xf32> to vector<64x4xf32>
    %c1_41 = arith.constant 1 : index
    %c0_42 = arith.constant 0 : index
    %c0_43 = arith.constant 0 : index
    %c0_44 = arith.constant 0 : index
    %32 = vector.load %arg2[%c1_41, %c0_42, %c0_43, %c0_44] : memref<3x3x4x8xf32, #tpu.memory_space<vmem>>, vector<1x1x4x8xf32>
    %33 = vector.shape_cast %32 : vector<1x1x4x8xf32> to vector<4x8xf32>
    %cst_45 = arith.constant dense<0.000000e+00> : vector<64x8xf32>
    %34 = tpu.matmul %31, %33, %cst_45 {dimension_numbers = #tpu.dot_dimension_numbers<[1], [0], [0], [1], [0, 0, 1, 1], [], []>} : vector<64x4xf32>, vector<4x8xf32>, vector<64x8xf32> -> vector<64x8xf32>
    %35 = arith.addf %29, %34 : vector<64x8xf32>
    %c1_46 = arith.constant 1 : index
    %c1_47 = arith.constant 1 : index
    %c0_48 = arith.constant 0 : index
    %36 = vector.load %arg7[%c1_46, %c1_47, %c0_48] : memref<10x10x4xf32, #tpu.memory_space<vmem>>, vector<8x8x4xf32>
    %37 = vector.shape_cast %36 : vector<8x8x4xf32> to vector<64x4xf32>
    %c1_49 = arith.constant 1 : index
    %c1_50 = arith.constant 1 : index
    %c0_51 = arith.constant 0 : index
    %c0_52 = arith.constant 0 : index
    %38 = vector.load %arg2[%c1_49, %c1_50, %c0_51, %c0_52] : memref<3x3x4x8xf32, #tpu.memory_space<vmem>>, vector<1x1x4x8xf32>
    %39 = vector.shape_cast %38 : vector<1x1x4x8xf32> to vector<4x8xf32>
    %cst_53 = arith.constant dense<0.000000e+00> : vector<64x8xf32>
    %40 = tpu.matmul %37, %39, %cst_53 {dimension_numbers = #tpu.dot_dimension_numbers<[1], [0], [0], [1], [0, 0, 1, 1], [], []>} : vector<64x4xf32>, vector<4x8xf32>, vector<64x8xf32> -> vector<64x8xf32>
    %41 = arith.addf %35, %40 : vector<64x8xf32>
    %c1_54 = arith.constant 1 : index
    %c2_55 = arith.constant 2 : index
    %c0_56 = arith.constant 0 : index
    %42 = vector.load %arg7[%c1_54, %c2_55, %c0_56] : memref<10x10x4xf32, #tpu.memory_space<vmem>>, vector<8x8x4xf32>
    %43 = vector.shape_cast %42 : vector<8x8x4xf32> to vector<64x4xf32>
    %c1_57 = arith.constant 1 : index
    %c2_58 = arith.constant 2 : index
    %c0_59 = arith.constant 0 : index
    %c0_60 = arith.constant 0 : index
    %44 = vector.load %arg2[%c1_57, %c2_58, %c0_59, %c0_60] : memref<3x3x4x8xf32, #tpu.memory_space<vmem>>, vector<1x1x4x8xf32>
    %45 = vector.shape_cast %44 : vector<1x1x4x8xf32> to vector<4x8xf32>
    %cst_61 = arith.constant dense<0.000000e+00> : vector<64x8xf32>
    %46 = tpu.matmul %43, %45, %cst_61 {dimension_numbers = #tpu.dot_dimension_numbers<[1], [0], [0], [1], [0, 0, 1, 1], [], []>} : vector<64x4xf32>, vector<4x8xf32>, vector<64x8xf32> -> vector<64x8xf32>
    %47 = arith.addf %41, %46 : vector<64x8xf32>
    %c2_62 = arith.constant 2 : index
    %c0_63 = arith.constant 0 : index
    %c0_64 = arith.constant 0 : index
    %48 = vector.load %arg7[%c2_62, %c0_63, %c0_64] : memref<10x10x4xf32, #tpu.memory_space<vmem>>, vector<8x8x4xf32>
    %49 = vector.shape_cast %48 : vector<8x8x4xf32> to vector<64x4xf32>
    %c2_65 = arith.constant 2 : index
    %c0_66 = arith.constant 0 : index
    %c0_67 = arith.constant 0 : index
    %c0_68 = arith.constant 0 : index
    %50 = vector.load %arg2[%c2_65, %c0_66, %c0_67, %c0_68] : memref<3x3x4x8xf32, #tpu.memory_space<vmem>>, vector<1x1x4x8xf32>
    %51 = vector.shape_cast %50 : vector<1x1x4x8xf32> to vector<4x8xf32>
    %cst_69 = arith.constant dense<0.000000e+00> : vector<64x8xf32>
    %52 = tpu.matmul %49, %51, %cst_69 {dimension_numbers = #tpu.dot_dimension_numbers<[1], [0], [0], [1], [0, 0, 1, 1], [], []>} : vector<64x4xf32>, vector<4x8xf32>, vector<64x8xf32> -> vector<64x8xf32>
    %53 = arith.addf %47, %52 : vector<64x8xf32>
    %c2_70 = arith.constant 2 : index
    %c1_71 = arith.constant 1 : index
    %c0_72 = arith.constant 0 : index
    %54 = vector.load %arg7[%c2_70, %c1_71, %c0_72] : memref<10x10x4xf32, #tpu.memory_space<vmem>>, vector<8x8x4xf32>
    %55 = vector.shape_cast %54 : vector<8x8x4xf32> to vector<64x4xf32>
    %c2_73 = arith.constant 2 : index
    %c1_74 = arith.constant 1 : index
    %c0_75 = arith.constant 0 : index
    %c0_76 = arith.constant 0 : index
    %56 = vector.load %arg2[%c2_73, %c1_74, %c0_75, %c0_76] : memref<3x3x4x8xf32, #tpu.memory_space<vmem>>, vector<1x1x4x8xf32>
    %57 = vector.shape_cast %56 : vector<1x1x4x8xf32> to vector<4x8xf32>
    %cst_77 = arith.constant dense<0.000000e+00> : vector<64x8xf32>
    %58 = tpu.matmul %55, %57, %cst_77 {dimension_numbers = #tpu.dot_dimension_numbers<[1], [0], [0], [1], [0, 0, 1, 1], [], []>} : vector<64x4xf32>, vector<4x8xf32>, vector<64x8xf32> -> vector<64x8xf32>
    %59 = arith.addf %53, %58 : vector<64x8xf32>
    %c2_78 = arith.constant 2 : index
    %c2_79 = arith.constant 2 : index
    %c0_80 = arith.constant 0 : index
    %60 = vector.load %arg7[%c2_78, %c2_79, %c0_80] : memref<10x10x4xf32, #tpu.memory_space<vmem>>, vector<8x8x4xf32>
    %61 = vector.shape_cast %60 : vector<8x8x4xf32> to vector<64x4xf32>
    %c2_81 = arith.constant 2 : index
    %c2_82 = arith.constant 2 : index
    %c0_83 = arith.constant 0 : index
    %c0_84 = arith.constant 0 : index
    %62 = vector.load %arg2[%c2_81, %c2_82, %c0_83, %c0_84] : memref<3x3x4x8xf32, #tpu.memory_space<vmem>>, vector<1x1x4x8xf32>
    %63 = vector.shape_cast %62 : vector<1x1x4x8xf32> to vector<4x8xf32>
    %cst_85 = arith.constant dense<0.000000e+00> : vector<64x8xf32>
    %64 = tpu.matmul %61, %63, %cst_85 {dimension_numbers = #tpu.dot_dimension_numbers<[1], [0], [0], [1], [0, 0, 1, 1], [], []>} : vector<64x4xf32>, vector<4x8xf32>, vector<64x8xf32> -> vector<64x8xf32>
    %65 = arith.addf %59, %64 : vector<64x8xf32>
    %cst_86 = arith.constant 0.000000e+00 : f32
    %66 = vector.broadcast %cst_86 : f32 to vector<64x8xf32>
    %67 = arith.maximumf %65, %66 : vector<64x8xf32>
    %68 = vector.shape_cast %67 : vector<64x8xf32> to vector<8x8x8xf32>
    %c1_87 = arith.constant 1 : index
    %c1_88 = arith.constant 1 : index
    %c0_89 = arith.constant 0 : index
    %69 = vector.load %arg8[%c1_87, %c1_88, %c0_89] : memref<10x10x8xf32, #tpu.memory_space<vmem>>, vector<8x8x8xf32>
    tpu.vector_store %arg8[%c1_87, %c1_88, %c0_89], %68 {strides = array<i32>} : memref<10x10x8xf32, #tpu.memory_space<vmem>>, vector<8x8x8xf32>,
    %c0_90 = arith.constant 0 : index
    %c0_91 = arith.constant 0 : index
    %70 = vector.load %arg5[%c0_90, %c0_91] : memref<1x8xf32, #tpu.memory_space<vmem>>, vector<1x8xf32>
    %71 = vector.shape_cast %70 : vector<1x8xf32> to vector<1x8xf32>
    %72 = vector.broadcast %71 : vector<1x8xf32> to vector<64x8xf32>
    %c0_92 = arith.constant 0 : index
    %c0_93 = arith.constant 0 : index
    %c0_94 = arith.constant 0 : index
    %73 = vector.load %arg8[%c0_92, %c0_93, %c0_94] : memref<10x10x8xf32, #tpu.memory_space<vmem>>, vector<8x8x8xf32>
    %74 = vector.shape_cast %73 : vector<8x8x8xf32> to vector<64x8xf32>
    %c0_95 = arith.constant 0 : index
    %c0_96 = arith.constant 0 : index
    %c0_97 = arith.constant 0 : index
    %c0_98 = arith.constant 0 : index
    %75 = vector.load %arg4[%c0_95, %c0_96, %c0_97, %c0_98] : memref<3x3x8x8xf32, #tpu.memory_space<vmem>>, vector<1x1x8x8xf32>
    %76 = vector.shape_cast %75 : vector<1x1x8x8xf32> to vector<8x8xf32>
    %cst_99 = arith.constant dense<0.000000e+00> : vector<64x8xf32>
    %77 = tpu.matmul %74, %76, %cst_99 {dimension_numbers = #tpu.dot_dimension_numbers<[1], [0], [0], [1], [0, 0, 1, 1], [], []>} : vector<64x8xf32>, vector<8x8xf32>, vector<64x8xf32> -> vector<64x8xf32>
    %78 = arith.addf %72, %77 : vector<64x8xf32>
    %c0_100 = arith.constant 0 : index
    %c1_101 = arith.constant 1 : index
    %c0_102 = arith.constant 0 : index
    %79 = vector.load %arg8[%c0_100, %c1_101, %c0_102] : memref<10x10x8xf32, #tpu.memory_space<vmem>>, vector<8x8x8xf32>
    %80 = vector.shape_cast %79 : vector<8x8x8xf32> to vector<64x8xf32>
    %c0_103 = arith.constant 0 : index
    %c1_104 = arith.constant 1 : index
    %c0_105 = arith.constant 0 : index
    %c0_106 = arith.constant 0 : index
    %81 = vector.load %arg4[%c0_103, %c1_104, %c0_105, %c0_106] : memref<3x3x8x8xf32, #tpu.memory_space<vmem>>, vector<1x1x8x8xf32>
    %82 = vector.shape_cast %81 : vector<1x1x8x8xf32> to vector<8x8xf32>
    %cst_107 = arith.constant dense<0.000000e+00> : vector<64x8xf32>
    %83 = tpu.matmul %80, %82, %cst_107 {dimension_numbers = #tpu.dot_dimension_numbers<[1], [0], [0], [1], [0, 0, 1, 1], [], []>} : vector<64x8xf32>, vector<8x8xf32>, vector<64x8xf32> -> vector<64x8xf32>
    %84 = arith.addf %78, %83 : vector<64x8xf32>
    %c0_108 = arith.constant 0 : index
    %c2_109 = arith.constant 2 : index
    %c0_110 = arith.constant 0 : index
    %85 = vector.load %arg8[%c0_108, %c2_109, %c0_110] : memref<10x10x8xf32, #tpu.memory_space<vmem>>, vector<8x8x8xf32>
    %86 = vector.shape_cast %85 : vector<8x8x8xf32> to vector<64x8xf32>
    %c0_111 = arith.constant 0 : index
    %c2_112 = arith.constant 2 : index
    %c0_113 = arith.constant 0 : index
    %c0_114 = arith.constant 0 : index
    %87 = vector.load %arg4[%c0_111, %c2_112, %c0_113, %c0_114] : memref<3x3x8x8xf32, #tpu.memory_space<vmem>>, vector<1x1x8x8xf32>
    %88 = vector.shape_cast %87 : vector<1x1x8x8xf32> to vector<8x8xf32>
    %cst_115 = arith.constant dense<0.000000e+00> : vector<64x8xf32>
    %89 = tpu.matmul %86, %88, %cst_115 {dimension_numbers = #tpu.dot_dimension_numbers<[1], [0], [0], [1], [0, 0, 1, 1], [], []>} : vector<64x8xf32>, vector<8x8xf32>, vector<64x8xf32> -> vector<64x8xf32>
    %90 = arith.addf %84, %89 : vector<64x8xf32>
    %c1_116 = arith.constant 1 : index
    %c0_117 = arith.constant 0 : index
    %c0_118 = arith.constant 0 : index
    %91 = vector.load %arg8[%c1_116, %c0_117, %c0_118] : memref<10x10x8xf32, #tpu.memory_space<vmem>>, vector<8x8x8xf32>
    %92 = vector.shape_cast %91 : vector<8x8x8xf32> to vector<64x8xf32>
    %c1_119 = arith.constant 1 : index
    %c0_120 = arith.constant 0 : index
    %c0_121 = arith.constant 0 : index
    %c0_122 = arith.constant 0 : index
    %93 = vector.load %arg4[%c1_119, %c0_120, %c0_121, %c0_122] : memref<3x3x8x8xf32, #tpu.memory_space<vmem>>, vector<1x1x8x8xf32>
    %94 = vector.shape_cast %93 : vector<1x1x8x8xf32> to vector<8x8xf32>
    %cst_123 = arith.constant dense<0.000000e+00> : vector<64x8xf32>
    %95 = tpu.matmul %92, %94, %cst_123 {dimension_numbers = #tpu.dot_dimension_numbers<[1], [0], [0], [1], [0, 0, 1, 1], [], []>} : vector<64x8xf32>, vector<8x8xf32>, vector<64x8xf32> -> vector<64x8xf32>
    %96 = arith.addf %90, %95 : vector<64x8xf32>
    %c1_124 = arith.constant 1 : index
    %c1_125 = arith.constant 1 : index
    %c0_126 = arith.constant 0 : index
    %97 = vector.load %arg8[%c1_124, %c1_125, %c0_126] : memref<10x10x8xf32, #tpu.memory_space<vmem>>, vector<8x8x8xf32>
    %98 = vector.shape_cast %97 : vector<8x8x8xf32> to vector<64x8xf32>
    %c1_127 = arith.constant 1 : index
    %c1_128 = arith.constant 1 : index
    %c0_129 = arith.constant 0 : index
    %c0_130 = arith.constant 0 : index
    %99 = vector.load %arg4[%c1_127, %c1_128, %c0_129, %c0_130] : memref<3x3x8x8xf32, #tpu.memory_space<vmem>>, vector<1x1x8x8xf32>
    %100 = vector.shape_cast %99 : vector<1x1x8x8xf32> to vector<8x8xf32>
    %cst_131 = arith.constant dense<0.000000e+00> : vector<64x8xf32>
    %101 = tpu.matmul %98, %100, %cst_131 {dimension_numbers = #tpu.dot_dimension_numbers<[1], [0], [0], [1], [0, 0, 1, 1], [], []>} : vector<64x8xf32>, vector<8x8xf32>, vector<64x8xf32> -> vector<64x8xf32>
    %102 = arith.addf %96, %101 : vector<64x8xf32>
    %c1_132 = arith.constant 1 : index
    %c2_133 = arith.constant 2 : index
    %c0_134 = arith.constant 0 : index
    %103 = vector.load %arg8[%c1_132, %c2_133, %c0_134] : memref<10x10x8xf32, #tpu.memory_space<vmem>>, vector<8x8x8xf32>
    %104 = vector.shape_cast %103 : vector<8x8x8xf32> to vector<64x8xf32>
    %c1_135 = arith.constant 1 : index
    %c2_136 = arith.constant 2 : index
    %c0_137 = arith.constant 0 : index
    %c0_138 = arith.constant 0 : index
    %105 = vector.load %arg4[%c1_135, %c2_136, %c0_137, %c0_138] : memref<3x3x8x8xf32, #tpu.memory_space<vmem>>, vector<1x1x8x8xf32>
    %106 = vector.shape_cast %105 : vector<1x1x8x8xf32> to vector<8x8xf32>
    %cst_139 = arith.constant dense<0.000000e+00> : vector<64x8xf32>
    %107 = tpu.matmul %104, %106, %cst_139 {dimension_numbers = #tpu.dot_dimension_numbers<[1], [0], [0], [1], [0, 0, 1, 1], [], []>} : vector<64x8xf32>, vector<8x8xf32>, vector<64x8xf32> -> vector<64x8xf32>
    %108 = arith.addf %102, %107 : vector<64x8xf32>
    %c2_140 = arith.constant 2 : index
    %c0_141 = arith.constant 0 : index
    %c0_142 = arith.constant 0 : index
    %109 = vector.load %arg8[%c2_140, %c0_141, %c0_142] : memref<10x10x8xf32, #tpu.memory_space<vmem>>, vector<8x8x8xf32>
    %110 = vector.shape_cast %109 : vector<8x8x8xf32> to vector<64x8xf32>
    %c2_143 = arith.constant 2 : index
    %c0_144 = arith.constant 0 : index
    %c0_145 = arith.constant 0 : index
    %c0_146 = arith.constant 0 : index
    %111 = vector.load %arg4[%c2_143, %c0_144, %c0_145, %c0_146] : memref<3x3x8x8xf32, #tpu.memory_space<vmem>>, vector<1x1x8x8xf32>
    %112 = vector.shape_cast %111 : vector<1x1x8x8xf32> to vector<8x8xf32>
    %cst_147 = arith.constant dense<0.000000e+00> : vector<64x8xf32>
    %113 = tpu.matmul %110, %112, %cst_147 {dimension_numbers = #tpu.dot_dimension_numbers<[1], [0], [0], [1], [0, 0, 1, 1], [], []>} : vector<64x8xf32>, vector<8x8xf32>, vector<64x8xf32> -> vector<64x8xf32>
    %114 = arith.addf %108, %113 : vector<64x8xf32>
    %c2_148 = arith.constant 2 : index
    %c1_149 = arith.constant 1 : index
    %c0_150 = arith.constant 0 : index
    %115 = vector.load %arg8[%c2_148, %c1_149, %c0_150] : memref<10x10x8xf32, #tpu.memory_space<vmem>>, vector<8x8x8xf32>
    %116 = vector.shape_cast %115 : vector<8x8x8xf32> to vector<64x8xf32>
    %c2_151 = arith.constant 2 : index
    %c1_152 = arith.constant 1 : index
    %c0_153 = arith.constant 0 : index
    %c0_154 = arith.constant 0 : index
    %117 = vector.load %arg4[%c2_151, %c1_152, %c0_153, %c0_154] : memref<3x3x8x8xf32, #tpu.memory_space<vmem>>, vector<1x1x8x8xf32>
    %118 = vector.shape_cast %117 : vector<1x1x8x8xf32> to vector<8x8xf32>
    %cst_155 = arith.constant dense<0.000000e+00> : vector<64x8xf32>
    %119 = tpu.matmul %116, %118, %cst_155 {dimension_numbers = #tpu.dot_dimension_numbers<[1], [0], [0], [1], [0, 0, 1, 1], [], []>} : vector<64x8xf32>, vector<8x8xf32>, vector<64x8xf32> -> vector<64x8xf32>
    %120 = arith.addf %114, %119 : vector<64x8xf32>
    %c2_156 = arith.constant 2 : index
    %c2_157 = arith.constant 2 : index
    %c0_158 = arith.constant 0 : index
    %121 = vector.load %arg8[%c2_156, %c2_157, %c0_158] : memref<10x10x8xf32, #tpu.memory_space<vmem>>, vector<8x8x8xf32>
    %122 = vector.shape_cast %121 : vector<8x8x8xf32> to vector<64x8xf32>
    %c2_159 = arith.constant 2 : index
    %c2_160 = arith.constant 2 : index
    %c0_161 = arith.constant 0 : index
    %c0_162 = arith.constant 0 : index
    %123 = vector.load %arg4[%c2_159, %c2_160, %c0_161, %c0_162] : memref<3x3x8x8xf32, #tpu.memory_space<vmem>>, vector<1x1x8x8xf32>
    %124 = vector.shape_cast %123 : vector<1x1x8x8xf32> to vector<8x8xf32>
    %cst_163 = arith.constant dense<0.000000e+00> : vector<64x8xf32>
    %125 = tpu.matmul %122, %124, %cst_163 {dimension_numbers = #tpu.dot_dimension_numbers<[1], [0], [0], [1], [0, 0, 1, 1], [], []>} : vector<64x8xf32>, vector<8x8xf32>, vector<64x8xf32> -> vector<64x8xf32>
    %126 = arith.addf %120, %125 : vector<64x8xf32>
    %cst_164 = arith.constant 0.000000e+00 : f32
    %127 = vector.broadcast %cst_164 : f32 to vector<64x8xf32>
    %128 = arith.maximumf %126, %127 : vector<64x8xf32>
    %129 = vector.shape_cast %128 : vector<64x8xf32> to vector<1x8x8x8xf32>
    %c0_165 = arith.constant 0 : index
    %c0_166 = arith.constant 0 : index
    %c0_167 = arith.constant 0 : index
    %c0_168 = arith.constant 0 : index
    %130 = vector.load %arg6[%c0_165, %c0_166, %c0_167, %c0_168] : memref<1x8x8x8xf32, #tpu.memory_space<vmem>>, vector<1x8x8x8xf32>
    tpu.vector_store %arg6[%c0_165, %c0_166, %c0_167, %c0_168], %129 {strides = array<i32>} : memref<1x8x8x8xf32, #tpu.memory_space<vmem>>, vector<1x8x8x8xf32>,
    return
  }
  func.func @transform_0(%arg0: i32) -> (i32, i32, i32, i32) {
    %c0_i32 = arith.constant 0 : i32
    %c0_i32_0 = arith.constant 0 : i32
    %c0_i32_1 = arith.constant 0 : i32
    %c0_i32_2 = arith.constant 0 : i32
    return %arg0, %c0_i32, %c0_i32_0, %c0_i32_1 : i32, i32, i32, i32
  }
  func.func @transform_1(%arg0: i32) -> (i32, i32, i32, i32) {
    %c0_i32 = arith.constant 0 : i32
    %c0_i32_0 = arith.constant 0 : i32
    %c0_i32_1 = arith.constant 0 : i32
    %c0_i32_2 = arith.constant 0 : i32
    %c0_i32_3 = arith.constant 0 : i32
    return %c0_i32, %c0_i32_0, %c0_i32_1, %c0_i32_2 : i32, i32, i32, i32
  }
  func.func @transform_2(%arg0: i32) -> (i32, i32) {
    %c0_i32 = arith.constant 0 : i32
    %c0_i32_0 = arith.constant 0 : i32
    %c0_i32_1 = arith.constant 0 : i32
    return %c0_i32, %c0_i32_0 : i32, i32
  }
  func.func @transform_3(%arg0: i32) -> (i32, i32, i32, i32) {
    %c0_i32 = arith.constant 0 : i32
    %c0_i32_0 = arith.constant 0 : i32
    %c0_i32_1 = arith.constant 0 : i32
    %c0_i32_2 = arith.constant 0 : i32
    %c0_i32_3 = arith.constant 0 : i32
    return %c0_i32, %c0_i32_0, %c0_i32_1, %c0_i32_2 : i32, i32, i32, i32
  }
  func.func @transform_4(%arg0: i32) -> (i32, i32) {
    %c0_i32 = arith.constant 0 : i32
    %c0_i32_0 = arith.constant 0 : i32
    %c0_i32_1 = arith.constant 0 : i32
    return %c0_i32, %c0_i32_0 : i32, i32
  }
  func.func @transform_5(%arg0: i32) -> (i32, i32, i32, i32) {
    %c0_i32 = arith.constant 0 : i32
    %c0_i32_0 = arith.constant 0 : i32
    %c0_i32_1 = arith.constant 0 : i32
    %c0_i32_2 = arith.constant 0 : i32
    return %arg0, %c0_i32, %c0_i32_0, %c0_i32_1 : i32, i32, i32, i32
  }
}

</mosaic_0001>

<bundles_post_ra>
// kernel: tpu_custom_call.1
= control target key start
LH: loop header
LB: loop body
LE: loop exit
PB: predicated region body
PF: predicated region fallthrough
CT: control target
= control target key end

     0   :  { %10 = vsyncpa [#allocation5], 0  ;;  %s6248_s0 = inlined_call_operand.vmem [shape: f32[2,16,16,4], index: 0, kind: input, shape index: {}]   ;;  %s6249_s1 = inlined_call_operand.vmem [shape: f32[3,3,4,8], index: 1, kind: input, shape index: {}]   ;;  %s6250_s2 = inlined_call_operand.vmem [shape: f32[1,8], index: 2, kind: input, shape index: {}]   ;;  %s6251_s3 = inlined_call_operand.vmem [shape: f32[3,3,8,8], index: 3, kind: input, shape index: {}]   ;;  %s6252_s4 = inlined_call_operand.vmem [shape: f32[1,8], index: 4, kind: input, shape index: {}]   ;;  %s6253_s5 = inlined_call_operand.hbm [shape: f32[2,8,8,8], index: 5, kind: output, shape index: {}]  }
   0x1   :  { %12 = vsyncpa [#allocation5 + $0x1], 0  ;;  %s5293_s18 = smov 0   ;;  %s5295_s19 = smov 0  }
   0x2   :  { %s5297_s20 = smov 0   ;;  %s5299_s21 = smov 0  }
   0x3 LB: > { %s5314_s22 = sadd.s32 4294967295, %s5256_s21   ;;  %s4520_s23 = sadd.s32 4294967294, %s5256_s21   ;;  %s5256_s21 = sphi %s5299_s21, %s6273_s21   ;;  %s5252_s20 = sphi %s5297_s20, %s6272_s20   ;;  %s5248_s19 = sphi %s5295_s19, %s6271_s19   ;;  %s5244_s18 = sphi %s5293_s18, %s6270_s18  }
   0x4   : > { %s5318_s24 = sadd.s32 1, %s5256_s21   ;;  %s135_s25 = sadd.s32 1, %s5252_s20 }
   0x5   : > { %s132_s26 = ssub.s32 %s5256_s21, %s5318_s24  ;;  %p145_p0 = scmp.ne.s32.totalorder %s5252_s20, %s5248_s19 }
   0x6   : > { %p133_p1 = scmp.eq.s32.totalorder %s132_s26, 0  ;;  %p146_p2 = scmp.eq.s32.totalorder %s5314_s22, 1 }
   0x7   : > { %p151_p3 = scmp.ne.s32.totalorder %s5248_s19, %s5244_s18  ;;  %p152_p4 = scmp.eq.s32.totalorder %s4520_s23, 1 }
   0x8   : > { %s5329_s27 = scalar_select %p133_p1, %s5252_s20, %s135_s25  }
   0x9   : > { %p5331_p5 = por %p146_p2, %p145_p0  ;;  %p5335_p6 = por %p152_p4, %p151_p3 }
   0xa   : > { %p4523_p7 = scmp.ge.s32.totalorder %s5256_s21, 1  ;;  %p190_p8 = scmp.lt.s32.totalorder %s5256_s21, 3 }
   0xc   : > { %p191_p9 = pnand %p4523_p7, %p190_p8 }
   0xe   : > { %194 = sbr.rel (%p191_p9) target bundleno = 764 (0x2fc), region = 40 }
  0x13   : > { %v1738_v0 = vld [vmem:[%s6249_s1] sm:$0xf]  ;;  %vm1763_vm0 = vcmask 1043456   ;;  %vm223_vm1 = vcmask 31744   ;;  %p218_p10 = scmp.lt.s32.totalorder %s5314_s22, 1  ;;  %v335_v1 = vlaneseq  ;;  %v5258_v2 = vmov 0.0  }
  0x14   : > { %4867 = vmatprep.subr.msk.mxu0 %vm1763_vm0, %v1738_v0  ;;  %224 = vst.msk [vmem:[#allocation2] sm:$0xff] %vm223_vm1, %v5258_v2  ;;  %227 = vst.msk [vmem:[#allocation2 + $0x10] sm:$0xff] %vm223_vm1, %v5258_v2  ;;  %v5369_v3 = vld [vmem:[%s6249_s1 + $0x8] sm:$0xf]  ;;  %vm225_vm2 = vcmask 25600   ;;  %vm1643_vm3 = vcmask 1041409  }
  0x15   : > { %229 = vst.msk [vmem:[#allocation2 + $0x20] sm:$0xff] %vm223_vm1, %v5258_v2  ;;  %231 = vst.msk [vmem:[#allocation2 + $0x30] sm:$0xff] %vm223_vm1, %v5258_v2  ;;  %4868 = vmatpush3.msk.msra.mxu0 %vm1763_vm0, %v1738_v0  ;;  %s219_s9 = scalar_select %p218_p10, %s5314_s22, 1  ;;  %v5259_v4 = vmov 1983009808   ;;  %v336_v6 = vshrl.u32 %v335_v1, 7 }
  0x16   : > { %233 = vst.msk [vmem:[#allocation2 + $0x40] sm:$0xff] %vm223_vm1, %v5258_v2  ;;  %235 = vst.msk [vmem:[#allocation2 + $0x50] sm:$0xff] %vm223_vm1, %v5258_v2  ;;  %v333_v5 = vunpack.c.l.s4 %v5259_v4  ;;  %v4537_v7 = vld [vmem:[%s6249_s1 + $0x4] sm:$0xf]  ;;  %4895 = vmatprep.subr.msk.mxu0 %vm1763_vm0, %v5369_v3  ;;  %vm1645_vm4 = vcmask 1042434   ;;  %vm1647_vm5 = vcmask 1043459  }
  0x17   : > { %237 = vst.msk [vmem:[#allocation2 + $0x60] sm:$0xff] %vm223_vm1, %v5258_v2  ;;  %239 = vst.msk [vmem:[#allocation2 + $0x70] sm:$0xff] %vm223_vm1, %v5258_v2  ;;  %4881 = vmatprep.subr.msk.mxu1 %vm1763_vm0, %v4537_v7  ;;  %s4703_s12 = sshll.u32 %s219_s9, 8  ;;  %vm1649_vm6 = vcmask 1044484   ;;  %vm1651_vm7 = vcmask 1045509   ;;  %vm1653_vm8 = vcmask 1046534  }
  0x18   : > { %241 = vst.msk [vmem:[#allocation2 + $0x80] sm:$0xff] %vm223_vm1, %v5258_v2  ;;  %243 = vst.msk [vmem:[#allocation2 + $0x90] sm:$0xff] %vm223_vm1, %v5258_v2  ;;  %v334_v8 = vunpack.c.0.s8 %v333_v5  ;;  %4882 = vmatpush3.msk.msra.mxu1 %vm1763_vm0, %v4537_v7  ;;  %s5405_s15 = scalar_lea.vmem %s6248_s0, %s4703_s12  ;;  %vm1655_vm9 = vcmask 1047559   ;;  %vm245_vm10 = vcmask 64512   ;;  %vm247_vm11 = vcmask 58368   ;;  %s215_s6 = sand.u32 1, %s5248_s19  }
  0x19   : > { %228 = vst.msk [vmem:[#allocation2 + $0x18] sm:$0x3] %vm225_vm2, %v5258_v2  ;;  %226 = vst.msk [vmem:[#allocation2 + $0x8] sm:$0x3] %vm225_vm2, %v5258_v2  ;;  %v267_v9 = vld [vmem:[%s5405_s15] sm:$0xff]  ;;  %v268_v10 = vld [vmem:[%s5405_s15 + $0x8] sm:$0xff] }
  0x1a   : > { %230 = vst.msk [vmem:[#allocation2 + $0x28] sm:$0x3] %vm225_vm2, %v5258_v2  ;;  %232 = vst.msk [vmem:[#allocation2 + $0x38] sm:$0x3] %vm225_vm2, %v5258_v2  ;;  %v269_v11 = vld [vmem:[%s5405_s15 + $0x10] sm:$0xff]  ;;  %v5410_v12 = vsub.s32 %v334_v8, %v336_v6  ;;  %v270_v13 = vld [vmem:[%s5405_s15 + $0x18] sm:$0xff]  ;;  %v331_v14 = vcombine.high %v267_v9, %v267_v9  ;;  %v348_v15 = vcombine.high %v268_v10, %v268_v10 }
  0x1b   : > { %234 = vst.msk [vmem:[#allocation2 + $0x48] sm:$0x3] %vm225_vm2, %v5258_v2  ;;  %236 = vst.msk [vmem:[#allocation2 + $0x58] sm:$0x3] %vm225_vm2, %v5258_v2  ;;  %v365_v16 = vcombine.high %v269_v11, %v269_v11  ;;  %v1730_v17 = vld [vmem:[#allocation2] sm:$0xff]  ;;  %v382_v21 = vcombine.high %v270_v13, %v270_v13  ;;  %s4524_s7 = sshll.u32 %s215_s6, 6 }
  0x1c   : > { %238 = vst.msk [vmem:[#allocation2 + $0x68] sm:$0x3] %vm225_vm2, %v5258_v2  ;;  %240 = vst.msk [vmem:[#allocation2 + $0x78] sm:$0x3] %vm225_vm2, %v5258_v2  ;;  %v338_v18 = vrot.slane %v267_v9, %v5410_v12  ;;  %v355_v19 = vrot.slane %v268_v10, %v5410_v12  ;;  %v372_v20 = vrot.slane %v269_v11, %v5410_v12  ;;  %4869 = vmatprep.mubr.msk.f32.mxu0 %vm223_vm1, %v1730_v17  ;;  %s6178_s8 = scalar_lea.vmem [#allocation4], %s4524_s7  ;;  %s4704_s9 = sshll.u32 %s5314_s22, 10 }
  0x1d   : > { %242 = vst.msk [vmem:[#allocation2 + $0x88] sm:$0x3] %vm225_vm2, %v5258_v2  ;;  %244 = vst.msk [vmem:[#allocation2 + $0x98] sm:$0x3] %vm225_vm2, %v5258_v2  ;;  %v345_v22 = vrot.slane %v331_v14, %v5410_v12  ;;  %v362_v23 = vrot.slane %v348_v15, %v5410_v12  ;;  %v379_v24 = vrot.slane %v365_v16, %v5410_v12  ;;  %s4458_s10 = sshll.u32 %s6178_s8, 4  ;;  %s6198_s13 = scalar_lea.hbm %s6253_s5, %s4704_s9  ;;  %s6200_s10 = int_to_ptr.vmem [resolvable:$true] %s4458_s10 }
  0x1e   : > { %v389_v25 = vrot.slane %v270_v13, %v5410_v12  ;;  %v346_v27 = vcombine.high %v338_v18, %v338_v18  ;;  %v363_v28 = vcombine.high %v355_v19, %v355_v19  ;;  %v380_v29 = vcombine.high %v372_v20, %v372_v20  ;;  %251 = vst.msk [vmem:[#allocation3 + $0x20] sm:$0xff] %vm245_vm10, %v5258_v2  ;;  %s6208_s22 = scalar_lea.sflag [#allocation5], %s215_s6  ;;  %s5196_s14 = scalar_lea.vmem %s6200_s10, 1024 }
  0x1f   : > { %v396_v30 = vrot.slane %v382_v21, %v5410_v12  ;;  %v347_v31 = vcombine.high %v345_v22, %v345_v22  ;;  %v364_v32 = vcombine.high %v362_v23, %v362_v23  ;;  %v381_v33 = vcombine.high %v379_v24, %v379_v24  ;;  %252 = vst.msk [vmem:[#allocation3 + $0x28] sm:$0x3] %vm247_vm11, %v5258_v2  ;;  %p5197_p11 = scmp.ne.s32.totalorder %s6200_s10, %s5196_s14 }
  0x20   : > { %v1880_v26 = vld [vmem:[#allocation2 + $0x1] sm:$0xff]  ;;  %v397_v34 = vcombine.high %v389_v25, %v389_v25  ;;  %v1003_v36 = vsel %vm225_vm2, %v338_v18, -inf  ;;  %v1004_v37 = vsel %vm225_vm2, %v372_v20, -inf  ;;  %v1012_v38 = vsel %vm225_vm2, %v346_v27, -inf  ;;  %246 = vst.msk [vmem:[#allocation3] sm:$0xff] %vm245_vm10, %v5258_v2  ;;  %249 = vst.msk [vmem:[#allocation3 + $0x10] sm:$0xff] %vm245_vm10, %v5258_v2 }
  0x21   : > { %4883 = vmatprep.mubr.msk.f32.mxu1 %vm223_vm1, %v1880_v26  ;;  %v398_v35 = vcombine.high %v396_v30, %v396_v30  ;;  %v1005_v39 = vmax.f32 %v1003_v36, %v1004_v37  ;;  %v1013_v40 = vsel %vm225_vm2, %v380_v29, -inf  ;;  %v1021_v41 = vsel %vm225_vm2, %v345_v22, -inf  ;;  %v271_v26 = vld [vmem:[%s5405_s15 + $0x20] sm:$0xff]  ;;  %248 = vst.msk [vmem:[#allocation3 + $0x8] sm:$0x3] %vm247_vm11, %v5258_v2  ;;  %p5198_p12 = pnand %p5197_p11, %p5331_p5 }
  0x22   : > { %v1022_v42 = vsel %vm225_vm2, %v379_v24, -inf  ;;  %v1014_v43 = vmax.f32 %v1012_v38, %v1013_v40  ;;  %v1030_v45 = vsel %vm225_vm2, %v347_v31, -inf  ;;  %v1031_v46 = vsel %vm225_vm2, %v381_v33, -inf  ;;  %v272_v38 = vld [vmem:[%s5405_s15 + $0x28] sm:$0xff]  ;;  %250 = vst.msk [vmem:[#allocation3 + $0x18] sm:$0x3] %vm247_vm11, %v5258_v2 }
  0x23   : > { %v1023_v44 = vmax.f32 %v1021_v41, %v1022_v42  ;;  %v1006_v47 = vrot.slane %v1005_v39, 4  ;;  %v1032_v48 = vmax.f32 %v1030_v45, %v1031_v46  ;;  %v1039_v49 = vsel %vm225_vm2, %v355_v19, -inf  ;;  %253 = vst.msk [vmem:[#allocation3 + $0x30] sm:$0xff] %vm245_vm10, %v5258_v2  ;;  %255 = vst.msk [vmem:[#allocation3 + $0x40] sm:$0xff] %vm245_vm10, %v5258_v2  ;;  %p5199_p13 = pneg %p5198_p12 }
  0x24   : > { %v1040_v50 = vsel %vm225_vm2, %v389_v25, -inf  ;;  %v1015_v51 = vrot.slane %v1014_v43, 4  ;;  %v1048_v54 = vsel %vm225_vm2, %v363_v28, -inf  ;;  %v1049_v57 = vsel %vm225_vm2, %v397_v34, -inf  ;;  %254 = vst.msk [vmem:[#allocation3 + $0x38] sm:$0x3] %vm247_vm11, %v5258_v2 }
  0x25   : > { %v1024_v52 = vrot.slane %v1023_v44, 4  ;;  %v1041_v53 = vmax.f32 %v1039_v49, %v1040_v50  ;;  %v1007_v55 = vmax.f32 %v1005_v39, %v1006_v47  ;;  %v1033_v56 = vrot.slane %v1032_v48, 4  ;;  %v273_v47 = vld [vmem:[%s5405_s15 + $0x30] sm:$0xff]  ;;  %256 = vst.msk [vmem:[#allocation3 + $0x48] sm:$0x3] %vm247_vm11, %v5258_v2 }
  0x26   : > { %v1057_v58 = vsel %vm225_vm2, %v362_v23, -inf  ;;  %v1016_v59 = vmax.f32 %v1014_v43, %v1015_v51  ;;  %v1050_v62 = vmax.f32 %v1048_v54, %v1049_v57  ;;  %v1058_v1 = vsel %vm225_vm2, %v396_v30, -inf  ;;  %v274_v51 = vld [vmem:[%s5405_s15 + $0x38] sm:$0xff]  ;;  %257 = vst.msk [vmem:[#allocation3 + $0x50] sm:$0xff] %vm245_vm10, %v5258_v2  ;;  %259 = vst.msk [vmem:[#allocation3 + $0x60] sm:$0xff] %vm245_vm10, %v5258_v2 }
  0x27   : > { %v1025_v60 = vmax.f32 %v1023_v44, %v1024_v52  ;;  %v1042_v61 = vrot.slane %v1041_v53, 4  ;;  %v1008_v63 = vrot.slane %v1007_v55, 2  ;;  %v1034_v0 = vmax.f32 %v1032_v48, %v1033_v56  ;;  %258 = vst.msk [vmem:[#allocation3 + $0x58] sm:$0x3] %vm247_vm11, %v5258_v2  ;;  %260 = vst.msk [vmem:[#allocation3 + $0x68] sm:$0x3] %vm247_vm11, %v5258_v2 }
  0x28   : > { %v1066_v4 = vsel %vm225_vm2, %v364_v32, -inf  ;;  %v1017_v5 = vrot.slane %v1016_v59, 2  ;;  %v1051_v8 = vrot.slane %v1050_v62, 4  ;;  %v1059_v11 = vmax.f32 %v1057_v58, %v1058_v1  ;;  %261 = vst.msk [vmem:[#allocation3 + $0x70] sm:$0xff] %vm245_vm10, %v5258_v2  ;;  %263 = vst.msk [vmem:[#allocation3 + $0x80] sm:$0xff] %vm245_vm10, %v5258_v2 }
  0x29   : > { %v1026_v6 = vrot.slane %v1025_v60, 2  ;;  %v1043_v7 = vmax.f32 %v1041_v53, %v1042_v61  ;;  %v1009_v9 = vmax.f32 %v1007_v55, %v1008_v63  ;;  %v1035_v10 = vrot.slane %v1034_v0, 2  ;;  %262 = vst.msk [vmem:[#allocation3 + $0x78] sm:$0x3] %vm247_vm11, %v5258_v2  ;;  %264 = vst.msk [vmem:[#allocation3 + $0x88] sm:$0x3] %vm247_vm11, %v5258_v2 }
  0x2a   : > { %v1067_v13 = vsel %vm225_vm2, %v398_v35, -inf  ;;  %v1018_v14 = vmax.f32 %v1016_v59, %v1017_v5  ;;  %v1052_v17 = vmax.f32 %v1050_v62, %v1051_v8  ;;  %v1060_v20 = vrot.slane %v1059_v11, 4  ;;  %265 = vst.msk [vmem:[#allocation3 + $0x90] sm:$0xff] %vm245_vm10, %v5258_v2 }
  0x2b   : > { %v1027_v15 = vmax.f32 %v1025_v60, %v1026_v6  ;;  %v1044_v16 = vrot.slane %v1043_v7, 2  ;;  %v1010_v18 = vrot.slane %v1009_v9, 1  ;;  %v1036_v19 = vmax.f32 %v1034_v0, %v1035_v10  ;;  %266 = vst.msk [vmem:[#allocation3 + $0x98] sm:$0x3] %vm247_vm11, %v5258_v2  ;;  %v5940_v2 = vld [vmem:[%s6251_s3 + $0x18] sm:$0xff] }
  0x2c   : > { %v1068_v21 = vmax.f32 %v1066_v4, %v1067_v13  ;;  %v1019_v22 = vrot.slane %v1018_v14, 1  ;;  %v1053_v25 = vrot.slane %v1052_v17, 2  ;;  %v1061_v29 = vmax.f32 %v1059_v11, %v1060_v20  ;;  %6259 = vst [vmem:[#allocation8_spill] sm:$0xff] %v5940_v2 }
  0x2d   : > { %v1028_v23 = vrot.slane %v1027_v15, 1  ;;  %v1045_v24 = vmax.f32 %v1043_v7, %v1044_v16  ;;  %v1011_v27 = vmax.f32 %v1009_v9, %v1010_v18  ;;  %v1037_v28 = vrot.slane %v1036_v19, 1 }
  0x2e   : > { %v1069_v30 = vrot.slane %v1068_v21, 4  ;;  %v1020_v31 = vmax.f32 %v1018_v14, %v1019_v22  ;;  %v1054_v34 = vmax.f32 %v1052_v17, %v1053_v25  ;;  %v1062_v36 = vrot.slane %v1061_v29, 2 }
  0x2f   : > { %v1029_v32 = vmax.f32 %v1027_v15, %v1028_v23  ;;  %v1046_v33 = vrot.slane %v1045_v24, 1  ;;  %v1038_v35 = vmax.f32 %v1036_v19, %v1037_v28  ;;  %v399_v39 = vcombine.high %v271_v26, %v271_v26 }
  0x30   : > { %v1070_v37 = vmax.f32 %v1068_v21, %v1069_v30  ;;  %v1055_v41 = vrot.slane %v1054_v34, 1  ;;  %v1644_v42 = vsel %vm1643_vm3, %v1020_v31, %v1011_v27  ;;  %v406_v43 = vrot.slane %v271_v26, %v5410_v12 }
  0x31   : > { %v1047_v40 = vmax.f32 %v1045_v24, %v1046_v33  ;;  %v1063_v44 = vmax.f32 %v1061_v29, %v1062_v36  ;;  %v1646_v46 = vsel %vm1645_vm4, %v1029_v32, %v1644_v42  ;;  %v413_v48 = vrot.slane %v399_v39, %v5410_v12 }
  0x32   : > { %v1071_v45 = vrot.slane %v1070_v37, 2  ;;  %v1056_v49 = vmax.f32 %v1054_v34, %v1055_v41  ;;  %v1648_v50 = vsel %vm1647_vm5, %v1038_v35, %v1646_v46  ;;  %v414_v52 = vcombine.high %v406_v43, %v406_v43 }
  0x33   : > { %v416_v53 = vcombine.high %v272_v38, %v272_v38  ;;  %v1064_v54 = vrot.slane %v1063_v44, 1  ;;  %v1650_v56 = vsel %vm1649_vm6, %v1047_v40, %v1648_v50  ;;  %v415_v57 = vcombine.high %v413_v48, %v413_v48 }
  0x34   : > { %v1072_v55 = vmax.f32 %v1070_v37, %v1071_v45  ;;  %v1652_v58 = vsel %vm1651_vm7, %v1056_v49, %v1650_v56  ;;  %v423_v59 = vrot.slane %v272_v38, %v5410_v12  ;;  %v433_v61 = vcombine.high %v273_v47, %v273_v47 }
  0x35   : > { %v430_v60 = vrot.slane %v416_v53, %v5410_v12  ;;  %v1065_v62 = vmax.f32 %v1063_v44, %v1064_v54  ;;  %v440_v0 = vrot.slane %v273_v47, %v5410_v12  ;;  %v450_v1 = vcombine.high %v274_v51, %v274_v51 }
  0x36   : > { %v1073_v63 = vrot.slane %v1072_v55, 1  ;;  %v431_v4 = vcombine.high %v423_v59, %v423_v59  ;;  %v447_v6 = vrot.slane %v433_v61, %v5410_v12  ;;  %v457_v7 = vrot.slane %v274_v51, %v5410_v12 }
  0x37   : > { %v432_v5 = vcombine.high %v430_v60, %v430_v60  ;;  %v1654_v9 = vsel %vm1653_vm8, %v1065_v62, %v1652_v58  ;;  %v448_v10 = vcombine.high %v440_v0, %v440_v0  ;;  %v464_v11 = vrot.slane %v450_v1, %v5410_v12 }
  0x38   : > { %v1074_v8 = vmax.f32 %v1072_v55, %v1073_v63  ;;  %v449_v13 = vcombine.high %v447_v6, %v447_v6  ;;  %v465_v14 = vcombine.high %v457_v7, %v457_v7  ;;  %v1075_v15 = vsel %vm225_vm2, %v406_v43, -inf }
  0x39   : > { %v1076_v16 = vsel %vm225_vm2, %v440_v0, -inf  ;;  %v466_v18 = vcombine.high %v464_v11, %v464_v11  ;;  %v1084_v20 = vsel %vm225_vm2, %v414_v52, -inf  ;;  %v1085_v21 = vsel %vm225_vm2, %v448_v10, -inf }
  0x3a   : > { %v1656_v17 = vsel %vm1655_vm9, %v1074_v8, %v1654_v9  ;;  %v1077_v19 = vmax.f32 %v1075_v15, %v1076_v16  ;;  %v1093_v22 = vsel %vm225_vm2, %v413_v48, -inf  ;;  %v1094_v23 = vsel %vm225_vm2, %v447_v6, -inf }
  0x3b   : > { %1715 = vst.msk [vmem:[#allocation2 + $0x11] sm:$0xff] %vm223_vm1, %v1656_v17  ;;  %v1102_v24 = vsel %vm225_vm2, %v415_v57, -inf  ;;  %v1086_v26 = vmax.f32 %v1084_v20, %v1085_v21  ;;  %v1095_v27 = vmax.f32 %v1093_v22, %v1094_v23  ;;  %v1103_v28 = vsel %vm225_vm2, %v449_v13, -inf  ;;  %v276_v22 = vld [vmem:[%s5405_s15 + $0x48] sm:$0xff] }
  0x3c   : > { %v1078_v25 = vrot.slane %v1077_v19, 4  ;;  %v1104_v29 = vmax.f32 %v1102_v24, %v1103_v28  ;;  %v1111_v30 = vsel %vm225_vm2, %v423_v59, -inf  ;;  %v1112_v31 = vsel %vm225_vm2, %v457_v7, -inf }
  0x3d   : > { %v1120_v32 = vsel %vm225_vm2, %v431_v4, -inf  ;;  %v1087_v34 = vrot.slane %v1086_v26, 4  ;;  %v1096_v35 = vrot.slane %v1095_v27, 4  ;;  %v1113_v36 = vmax.f32 %v1111_v30, %v1112_v31  ;;  %v277_v31 = vld [vmem:[%s5405_s15 + $0x50] sm:$0xff] }
  0x3e   : > { %v1079_v33 = vmax.f32 %v1077_v19, %v1078_v25  ;;  %v1105_v37 = vrot.slane %v1104_v29, 4  ;;  %v1121_v38 = vsel %vm225_vm2, %v465_v14, -inf  ;;  %v1129_v39 = vsel %vm225_vm2, %v430_v60, -inf }
  0x3f   : > { %v1130_v40 = vsel %vm225_vm2, %v464_v11, -inf  ;;  %v1088_v42 = vmax.f32 %v1086_v26, %v1087_v34  ;;  %v1097_v43 = vmax.f32 %v1095_v27, %v1096_v35  ;;  %v1114_v44 = vrot.slane %v1113_v36, 4 }
  0x40   : > { %v1080_v41 = vrot.slane %v1079_v33, 2  ;;  %v1106_v45 = vmax.f32 %v1104_v29, %v1105_v37  ;;  %v1122_v46 = vmax.f32 %v1120_v32, %v1121_v38  ;;  %v1131_v47 = vmax.f32 %v1129_v39, %v1130_v40 }
  0x41   : > { %v1138_v48 = vsel %vm225_vm2, %v432_v5, -inf  ;;  %v1089_v52 = vrot.slane %v1088_v42, 2  ;;  %v1098_v53 = vrot.slane %v1097_v43, 2  ;;  %v1115_v54 = vmax.f32 %v1113_v36, %v1114_v44  ;;  %v275_v5 = vld [vmem:[%s5405_s15 + $0x40] sm:$0xff] }
  0x42   : > { %v1731_v49 = vld [vmem:[#allocation2 + $0x10] sm:$0xff]  ;;  %v1081_v51 = vmax.f32 %v1079_v33, %v1080_v41  ;;  %v1107_v55 = vrot.slane %v1106_v45, 2  ;;  %v1123_v56 = vrot.slane %v1122_v46, 4  ;;  %v1132_v57 = vrot.slane %v1131_v47, 4  ;;  %v278_v33 = vld [vmem:[%s5405_s15 + $0x58] sm:$0xff] }
  0x43   : > { %v1881_v50 = vld [vmem:[#allocation2 + $0x11] sm:$0xff]  ;;  %4870 = vmatmul.mubr.msk.f32.vlgmr.msra.gmra.mxu0 %vm223_vm1, %v1731_v49  ;;  %v1139_v58 = vsel %vm225_vm2, %v466_v18, -inf  ;;  %v1090_v60 = vmax.f32 %v1088_v42, %v1089_v52  ;;  %v1099_v61 = vmax.f32 %v1097_v43, %v1098_v53  ;;  %v1116_v62 = vrot.slane %v1115_v54, 2 }
  0x44   : > { %4884 = vmatmul.mubr.msk.f32.vlgmr.msra.gmra.mxu1 %vm223_vm1, %v1881_v50  ;;  %4896 = vmatpush3.msk.msra.mxu0 %vm1763_vm0, %v5369_v3  ;;  %v1082_v59 = vrot.slane %v1081_v51, 1  ;;  %v1108_v63 = vmax.f32 %v1106_v45, %v1107_v55  ;;  %v1124_v0 = vmax.f32 %v1122_v46, %v1123_v56  ;;  %v1133_v1 = vmax.f32 %v1131_v47, %v1132_v57 }
  0x45   : > { %v1140_v4 = vmax.f32 %v1138_v48, %v1139_v58  ;;  %v1091_v7 = vrot.slane %v1090_v60, 1  ;;  %v1100_v8 = vrot.slane %v1099_v61, 1  ;;  %v1117_v9 = vmax.f32 %v1115_v54, %v1116_v62 }
  0x46   : > { %v1083_v6 = vmax.f32 %v1081_v51, %v1082_v59  ;;  %v1109_v10 = vrot.slane %v1108_v63, 1  ;;  %v1125_v11 = vrot.slane %v1124_v0, 2  ;;  %v1134_v13 = vrot.slane %v1133_v1, 2 }
  0x47   : > { %v1141_v14 = vrot.slane %v1140_v4, 4  ;;  %v1092_v15 = vmax.f32 %v1090_v60, %v1091_v7  ;;  %v1101_v3 = vmax.f32 %v1099_v61, %v1100_v8  ;;  %v1118_v16 = vrot.slane %v1117_v9, 1 }
  0x48   : > { %v467_v17 = vcombine.high %v275_v5, %v275_v5  ;;  %v1110_v18 = vmax.f32 %v1108_v63, %v1109_v10  ;;  %v1126_v19 = vmax.f32 %v1124_v0, %v1125_v11  ;;  %v1135_v20 = vmax.f32 %v1133_v1, %v1134_v13 }
  0x49   : > { %v1142_v21 = vmax.f32 %v1140_v4, %v1141_v14  ;;  %v1119_v23 = vmax.f32 %v1117_v9, %v1118_v16  ;;  %v1657_v24 = vsel %vm1643_vm3, %v1092_v15, %v1083_v6  ;;  %v474_v25 = vrot.slane %v275_v5, %v5410_v12 }
  0x4a   : > { %v481_v26 = vrot.slane %v467_v17, %v5410_v12  ;;  %v1127_v27 = vrot.slane %v1126_v19, 1  ;;  %v1136_v28 = vrot.slane %v1135_v20, 1  ;;  %v1658_v30 = vsel %vm1645_vm4, %v1101_v3, %v1657_v24 }
  0x4b   : > { %v1143_v29 = vrot.slane %v1142_v21, 2  ;;  %v1659_v32 = vsel %vm1647_vm5, %v1110_v18, %v1658_v30  ;;  %v482_v34 = vcombine.high %v474_v25, %v474_v25  ;;  %v484_v36 = vcombine.high %v276_v22, %v276_v22 }
  0x4c   : > { %v483_v35 = vcombine.high %v481_v26, %v481_v26  ;;  %v1128_v37 = vmax.f32 %v1126_v19, %v1127_v27  ;;  %v1137_v38 = vmax.f32 %v1135_v20, %v1136_v28  ;;  %v1660_v40 = vsel %vm1649_vm6, %v1119_v23, %v1659_v32  ;;  %v4557_v27 = vld [vmem:[%s6249_s1 + $0xc] sm:$0xf]  ;;  %v4567_v32 = vld [vmem:[%s6249_s1 + $0x10] sm:$0xf] }
  0x4d   : > { %v1144_v39 = vmax.f32 %v1142_v21, %v1143_v29  ;;  %v491_v41 = vrot.slane %v276_v22, %v5410_v12  ;;  %v498_v42 = vrot.slane %v484_v36, %v5410_v12  ;;  %v501_v43 = vcombine.high %v277_v31, %v277_v31  ;;  %4909 = vmatprep.subr.msk.mxu1 %vm1763_vm0, %v4557_v27 }
  0x4e   : > { %v508_v44 = vrot.slane %v277_v31, %v5410_v12  ;;  %v1661_v46 = vsel %vm1651_vm7, %v1128_v37, %v1660_v40  ;;  %v518_v47 = vcombine.high %v278_v33, %v278_v33  ;;  %v525_v48 = vrot.slane %v278_v33, %v5410_v12  ;;  %4910 = vmatpush3.msk.msra.mxu1 %vm1763_vm0, %v4557_v27 }
  0x4f   : > { %v1145_v45 = vrot.slane %v1144_v39, 1  ;;  %v1662_v49 = vsel %vm1653_vm8, %v1137_v38, %v1661_v46  ;;  %v499_v50 = vcombine.high %v491_v41, %v491_v41  ;;  %v500_v51 = vcombine.high %v498_v42, %v498_v42  ;;  %4923 = vmatprep.subr.msk.mxu0 %vm1763_vm0, %v4567_v32 }
  0x50   : > { %v515_v52 = vrot.slane %v501_v43, %v5410_v12  ;;  %v516_v54 = vcombine.high %v508_v44, %v508_v44  ;;  %v532_v55 = vrot.slane %v518_v47, %v5410_v12  ;;  %v533_v56 = vcombine.high %v525_v48, %v525_v48 }
  0x51   : > { %v1146_v53 = vmax.f32 %v1144_v39, %v1145_v45  ;;  %v1147_v58 = vsel %vm225_vm2, %v474_v25, -inf  ;;  %v1148_v59 = vsel %vm225_vm2, %v508_v44, -inf  ;;  %v1156_v60 = vsel %vm225_vm2, %v482_v34, -inf }
  0x52   : > { %v517_v57 = vcombine.high %v515_v52, %v515_v52  ;;  %v534_v62 = vcombine.high %v532_v55, %v532_v55  ;;  %v1149_v63 = vmax.f32 %v1147_v58, %v1148_v59  ;;  %v1157_v0 = vsel %vm225_vm2, %v516_v54, -inf }
  0x53   : > { %v1663_v61 = vsel %vm1655_vm9, %v1146_v53, %v1662_v49  ;;  %v1158_v1 = vmax.f32 %v1156_v60, %v1157_v0  ;;  %v1165_v4 = vsel %vm225_vm2, %v481_v26, -inf  ;;  %v1166_v5 = vsel %vm225_vm2, %v515_v52, -inf }
  0x54   : > { %1716 = vst.msk [vmem:[#allocation2 + $0x21] sm:$0xff] %vm223_vm1, %v1663_v61  ;;  %v1174_v6 = vsel %vm225_vm2, %v483_v35, -inf  ;;  %v1150_v7 = vrot.slane %v1149_v63, 4  ;;  %v1167_v8 = vmax.f32 %v1165_v4, %v1166_v5  ;;  %v1175_v9 = vsel %vm225_vm2, %v517_v57, -inf }
  0x55   : > { %v1183_v10 = vsel %vm225_vm2, %v491_v41, -inf  ;;  %v1159_v11 = vrot.slane %v1158_v1, 4  ;;  %v1176_v13 = vmax.f32 %v1174_v6, %v1175_v9  ;;  %v1184_v14 = vsel %vm225_vm2, %v525_v48, -inf  ;;  %v280_v6 = vld [vmem:[%s5405_s15 + $0x68] sm:$0xff] }
  0x56   : > { %v1192_v15 = vsel %vm225_vm2, %v499_v50, -inf  ;;  %v1151_v3 = vmax.f32 %v1149_v63, %v1150_v7  ;;  %v1168_v16 = vrot.slane %v1167_v8, 4  ;;  %v1185_v17 = vmax.f32 %v1183_v10, %v1184_v14 }
  0x57   : > { %v1193_v18 = vsel %vm225_vm2, %v533_v56, -inf  ;;  %v1160_v19 = vmax.f32 %v1158_v1, %v1159_v11  ;;  %v1177_v20 = vrot.slane %v1176_v13, 4  ;;  %v1201_v22 = vsel %vm225_vm2, %v498_v42, -inf }
  0x58   : > { %v1194_v21 = vmax.f32 %v1192_v15, %v1193_v18  ;;  %v1152_v23 = vrot.slane %v1151_v3, 2  ;;  %v1169_v24 = vmax.f32 %v1167_v8, %v1168_v16  ;;  %v1186_v25 = vrot.slane %v1185_v17, 4  ;;  %v281_v15 = vld [vmem:[%s5405_s15 + $0x70] sm:$0xff]  ;;  %v282_v18 = vld [vmem:[%s5405_s15 + $0x78] sm:$0xff] }
  0x59   : > { %v1202_v26 = vsel %vm225_vm2, %v532_v55, -inf  ;;  %v1161_v28 = vrot.slane %v1160_v19, 2  ;;  %v1178_v29 = vmax.f32 %v1176_v13, %v1177_v20  ;;  %v1210_v37 = vsel %vm225_vm2, %v500_v51, -inf  ;;  %v279_v51 = vld [vmem:[%s5405_s15 + $0x60] sm:$0xff] }
  0x5a   : > { %v1195_v30 = vrot.slane %v1194_v21, 4  ;;  %v1203_v31 = vmax.f32 %v1201_v22, %v1202_v26  ;;  %v1153_v34 = vmax.f32 %v1151_v3, %v1152_v23  ;;  %v1170_v35 = vrot.slane %v1169_v24, 2 }
  0x5b   : > { %v1732_v33 = vld [vmem:[#allocation2 + $0x20] sm:$0xff]  ;;  %v1187_v36 = vmax.f32 %v1185_v17, %v1186_v25  ;;  %v1162_v39 = vmax.f32 %v1160_v19, %v1161_v28  ;;  %v1179_v40 = vrot.slane %v1178_v29, 2  ;;  %v1211_v46 = vsel %vm225_vm2, %v534_v62, -inf }
  0x5c   : > { %v1882_v38 = vld [vmem:[#allocation2 + $0x21] sm:$0xff]  ;;  %4872 = vmatprep.mubr.msk.f32.mxu0 %vm223_vm1, %v1732_v33  ;;  %v1196_v41 = vmax.f32 %v1194_v21, %v1195_v30  ;;  %v1204_v42 = vrot.slane %v1203_v31, 4  ;;  %v1154_v43 = vrot.slane %v1153_v34, 1  ;;  %v1171_v44 = vmax.f32 %v1169_v24, %v1170_v35 }
  0x5d   : > { %4886 = vmatprep.mubr.msk.f32.mxu1 %vm223_vm1, %v1882_v38  ;;  %v1188_v45 = vrot.slane %v1187_v36, 2  ;;  %v1163_v47 = vrot.slane %v1162_v39, 1  ;;  %v1180_v48 = vmax.f32 %v1178_v29, %v1179_v40  ;;  %v1212_v55 = vmax.f32 %v1210_v37, %v1211_v46  ;;  %v4577_v37 = vld [vmem:[%s6249_s1 + $0x14] sm:$0xf] }
  0x5e   : > { %v1197_v49 = vrot.slane %v1196_v41, 2  ;;  %v1205_v50 = vmax.f32 %v1203_v31, %v1204_v42  ;;  %v1155_v52 = vmax.f32 %v1153_v34, %v1154_v43  ;;  %v1172_v53 = vrot.slane %v1171_v44, 1  ;;  %4937 = vmatprep.subr.msk.mxu1 %vm1763_vm0, %v4577_v37 }
  0x5f   : > { %v1189_v54 = vmax.f32 %v1187_v36, %v1188_v45  ;;  %v1164_v56 = vmax.f32 %v1162_v39, %v1163_v47  ;;  %v1181_v57 = vrot.slane %v1180_v48, 1  ;;  %v1213_v63 = vrot.slane %v1212_v55, 4 }
  0x60   : > { %v1198_v58 = vmax.f32 %v1196_v41, %v1197_v49  ;;  %v1206_v59 = vrot.slane %v1205_v50, 2  ;;  %v1173_v60 = vmax.f32 %v1171_v44, %v1172_v53  ;;  %v535_v0 = vcombine.high %v279_v51, %v279_v51 }
  0x61   : > { %v1190_v61 = vrot.slane %v1189_v54, 1  ;;  %v1182_v62 = vmax.f32 %v1180_v48, %v1181_v57  ;;  %v1664_v5 = vsel %vm1643_vm3, %v1164_v56, %v1155_v52  ;;  %v1214_v8 = vmax.f32 %v1212_v55, %v1213_v63 }
  0x62   : > { %v1199_v1 = vrot.slane %v1198_v58, 1  ;;  %v1207_v4 = vmax.f32 %v1205_v50, %v1206_v59  ;;  %v1665_v9 = vsel %vm1645_vm4, %v1173_v60, %v1664_v5  ;;  %v542_v10 = vrot.slane %v279_v51, %v5410_v12 }
  0x63   : > { %v1191_v7 = vmax.f32 %v1189_v54, %v1190_v61  ;;  %v1666_v14 = vsel %vm1647_vm5, %v1182_v62, %v1665_v9  ;;  %v549_v3 = vrot.slane %v535_v0, %v5410_v12  ;;  %v1215_v16 = vrot.slane %v1214_v8, 2 }
  0x64   : > { %v1200_v11 = vmax.f32 %v1198_v58, %v1199_v1  ;;  %v1208_v13 = vrot.slane %v1207_v4, 1  ;;  %v550_v19 = vcombine.high %v542_v10, %v542_v10  ;;  %v552_v20 = vcombine.high %v280_v6, %v280_v6 }
  0x65   : > { %v1667_v17 = vsel %vm1649_vm6, %v1191_v7, %v1666_v14  ;;  %v551_v23 = vcombine.high %v549_v3, %v549_v3  ;;  %v559_v24 = vrot.slane %v280_v6, %v5410_v12  ;;  %v1216_v25 = vmax.f32 %v1214_v8, %v1215_v16 }
  0x66   : > { %v1209_v21 = vmax.f32 %v1207_v4, %v1208_v13  ;;  %v1668_v22 = vsel %vm1651_vm7, %v1200_v11, %v1667_v17  ;;  %v566_v26 = vrot.slane %v552_v20, %v5410_v12  ;;  %v569_v27 = vcombine.high %v281_v15, %v281_v15 }
  0x67   : > { %v576_v28 = vrot.slane %v281_v15, %v5410_v12  ;;  %v567_v30 = vcombine.high %v559_v24, %v559_v24  ;;  %v586_v31 = vcombine.high %v282_v18, %v282_v18  ;;  %v593_v32 = vrot.slane %v282_v18, %v5410_v12 }
  0x68   : > { %v1669_v29 = vsel %vm1653_vm8, %v1209_v21, %v1668_v22  ;;  %v1217_v33 = vrot.slane %v1216_v25, 1  ;;  %v568_v34 = vcombine.high %v566_v26, %v566_v26  ;;  %v583_v35 = vrot.slane %v569_v27, %v5410_v12 }
  0x69   : > { %v584_v36 = vcombine.high %v576_v28, %v576_v28  ;;  %v600_v38 = vrot.slane %v586_v31, %v5410_v12  ;;  %v601_v39 = vcombine.high %v593_v32, %v593_v32  ;;  %v1219_v40 = vsel %vm225_vm2, %v542_v10, -inf }
  0x6a   : > { %v1220_v41 = vsel %vm225_vm2, %v576_v28, -inf  ;;  %v1218_v42 = vmax.f32 %v1216_v25, %v1217_v33  ;;  %v585_v43 = vcombine.high %v583_v35, %v583_v35  ;;  %v1228_v45 = vsel %vm225_vm2, %v550_v19, -inf }
  0x6b   : > { %v1221_v44 = vmax.f32 %v1219_v40, %v1220_v41  ;;  %v602_v46 = vcombine.high %v600_v38, %v600_v38  ;;  %v1229_v47 = vsel %vm225_vm2, %v584_v36, -inf  ;;  %v1237_v48 = vsel %vm225_vm2, %v549_v3, -inf }
  0x6c   : > { %v1238_v49 = vsel %vm225_vm2, %v583_v35, -inf  ;;  %v1670_v50 = vsel %vm1655_vm9, %v1218_v42, %v1669_v29  ;;  %v1230_v52 = vmax.f32 %v1228_v45, %v1229_v47  ;;  %v1246_v54 = vsel %vm225_vm2, %v551_v23, -inf  ;;  %v284_v47 = vld [vmem:[%s5405_s15 + $0x88] sm:$0xff] }
  0x6d   : > { %v1222_v51 = vrot.slane %v1221_v44, 4  ;;  %v1239_v53 = vmax.f32 %v1237_v48, %v1238_v49  ;;  %1717 = vst.msk [vmem:[#allocation2 + $0x31] sm:$0xff] %vm223_vm1, %v1670_v50  ;;  %v1247_v55 = vsel %vm225_vm2, %v585_v43, -inf  ;;  %v1255_v56 = vsel %vm225_vm2, %v559_v24, -inf }
  0x6e   : > { %v1256_v57 = vsel %vm225_vm2, %v593_v32, -inf  ;;  %v1231_v59 = vrot.slane %v1230_v52, 4  ;;  %v1248_v61 = vmax.f32 %v1246_v54, %v1247_v55  ;;  %v1264_v0 = vsel %vm225_vm2, %v567_v30, -inf  ;;  %v283_v30 = vld [vmem:[%s5405_s15 + $0x80] sm:$0xff] }
  0x6f   : > { %v1223_v58 = vmax.f32 %v1221_v44, %v1222_v51  ;;  %v1240_v60 = vrot.slane %v1239_v53, 4  ;;  %v1257_v63 = vmax.f32 %v1255_v56, %v1256_v57  ;;  %v1265_v62 = vsel %vm225_vm2, %v601_v39, -inf  ;;  %v285_v56 = vld [vmem:[%s5405_s15 + $0x90] sm:$0xff] }
  0x70   : > { %v1273_v1 = vsel %vm225_vm2, %v566_v26, -inf  ;;  %v1232_v5 = vmax.f32 %v1230_v52, %v1231_v59  ;;  %v1249_v7 = vrot.slane %v1248_v61, 4  ;;  %v1266_v9 = vmax.f32 %v1264_v0, %v1265_v62 }
  0x71   : > { %v1224_v4 = vrot.slane %v1223_v58, 2  ;;  %v1241_v6 = vmax.f32 %v1239_v53, %v1240_v60  ;;  %v1258_v8 = vrot.slane %v1257_v63, 4  ;;  %v1274_v10 = vsel %vm225_vm2, %v600_v38, -inf }
  0x72   : > { %v1282_v11 = vsel %vm225_vm2, %v568_v34, -inf  ;;  %v1233_v14 = vrot.slane %v1232_v5, 2  ;;  %v1250_v3 = vmax.f32 %v1248_v61, %v1249_v7  ;;  %v1267_v17 = vrot.slane %v1266_v9, 4 }
  0x73   : > { %v1225_v13 = vmax.f32 %v1223_v58, %v1224_v4  ;;  %v1242_v15 = vrot.slane %v1241_v6, 2  ;;  %v1259_v16 = vmax.f32 %v1257_v63, %v1258_v8  ;;  %v1275_v18 = vmax.f32 %v1273_v1, %v1274_v10  ;;  %v286_v1 = vld [vmem:[%s5405_s15 + $0x98] sm:$0xff] }
  0x74   : > { %v1283_v19 = vsel %vm225_vm2, %v602_v46, -inf  ;;  %v5566_v20 = vld [vmem:[#allocation2 + $0x30] sm:$0xff]  ;;  %v1234_v23 = vmax.f32 %v1232_v5, %v1233_v14  ;;  %v1251_v25 = vrot.slane %v1250_v3, 2  ;;  %v1268_v27 = vmax.f32 %v1266_v9, %v1267_v17 }
  0x75   : > { %v1883_v21 = vld [vmem:[#allocation2 + $0x31] sm:$0xff]  ;;  %v1226_v22 = vrot.slane %v1225_v13, 1  ;;  %v1243_v24 = vmax.f32 %v1241_v6, %v1242_v15  ;;  %4873 = vmatmul.mubr.msk.f32.gmra.mxu0 %vm223_vm1, %v5566_v20  ;;  %v1260_v26 = vrot.slane %v1259_v16, 2  ;;  %v1276_v28 = vrot.slane %v1275_v18, 4 }
  0x76   : > { %4887 = vmatmul.mubr.msk.f32.gmra.mxu1 %vm223_vm1, %v1883_v21  ;;  %v1284_v29 = vmax.f32 %v1282_v11, %v1283_v19  ;;  %v1235_v32 = vrot.slane %v1234_v23, 1  ;;  %v1252_v34 = vmax.f32 %v1250_v3, %v1251_v25  ;;  %v1269_v36 = vrot.slane %v1268_v27, 2 }
  0x77   : > { %v1227_v31 = vmax.f32 %v1225_v13, %v1226_v22  ;;  %v1244_v33 = vrot.slane %v1243_v24, 1  ;;  %v1261_v35 = vmax.f32 %v1259_v16, %v1260_v26  ;;  %v1277_v37 = vmax.f32 %v1275_v18, %v1276_v28 }
  0x78   : > { %v1285_v38 = vrot.slane %v1284_v29, 4  ;;  %v1236_v39 = vmax.f32 %v1234_v23, %v1235_v32  ;;  %v1253_v41 = vrot.slane %v1252_v34, 1  ;;  %v603_v42 = vcombine.high %v283_v30, %v283_v30 }
  0x79   : > { %v1245_v40 = vmax.f32 %v1243_v24, %v1244_v33  ;;  %v1262_v43 = vrot.slane %v1261_v35, 1  ;;  %v1270_v44 = vmax.f32 %v1268_v27, %v1269_v36  ;;  %v1278_v45 = vrot.slane %v1277_v37, 2 }
  0x7a   : > { %v1286_v46 = vmax.f32 %v1284_v29, %v1285_v38  ;;  %v1254_v48 = vmax.f32 %v1252_v34, %v1253_v41  ;;  %v1671_v49 = vsel %vm1643_vm3, %v1236_v39, %v1227_v31  ;;  %v610_v50 = vrot.slane %v283_v30, %v5410_v12 }
  0x7b   : > { %v617_v51 = vrot.slane %v603_v42, %v5410_v12  ;;  %v1263_v52 = vmax.f32 %v1261_v35, %v1262_v43  ;;  %v1271_v53 = vrot.slane %v1270_v44, 1  ;;  %v1279_v54 = vmax.f32 %v1277_v37, %v1278_v45 }
  0x7c   : > { %v1287_v55 = vrot.slane %v1286_v46, 2  ;;  %v1672_v57 = vsel %vm1645_vm4, %v1245_v40, %v1671_v49  ;;  %v618_v58 = vcombine.high %v610_v50, %v610_v50  ;;  %v620_v60 = vcombine.high %v284_v47, %v284_v47 }
  0x7d   : > { %v619_v59 = vcombine.high %v617_v51, %v617_v51  ;;  %v1272_v61 = vmax.f32 %v1270_v44, %v1271_v53  ;;  %v1280_v63 = vrot.slane %v1279_v54, 1  ;;  %v1673_v62 = vsel %vm1647_vm5, %v1254_v48, %v1672_v57 }
  0x7e   : > { %v1288_v0 = vmax.f32 %v1286_v46, %v1287_v55  ;;  %v1674_v4 = vsel %vm1649_vm6, %v1263_v52, %v1673_v62  ;;  %v627_v5 = vrot.slane %v284_v47, %v5410_v12  ;;  %v634_v6 = vrot.slane %v620_v60, %v5410_v12 }
  0x7f   : > { %v637_v7 = vcombine.high %v285_v56, %v285_v56  ;;  %v1281_v8 = vmax.f32 %v1279_v54, %v1280_v63  ;;  %v1675_v10 = vsel %vm1651_vm7, %v1272_v61, %v1674_v4  ;;  %v644_v11 = vrot.slane %v285_v56, %v5410_v12 }
  0x80   : > { %v1289_v9 = vrot.slane %v1288_v0, 1  ;;  %v635_v13 = vcombine.high %v627_v5, %v627_v5  ;;  %v636_v14 = vcombine.high %v634_v6, %v634_v6  ;;  %v654_v3 = vcombine.high %v286_v1, %v286_v1 }
  0x81   : > { %v651_v15 = vrot.slane %v637_v7, %v5410_v12  ;;  %v1676_v17 = vsel %vm1653_vm8, %v1281_v8, %v1675_v10  ;;  %v652_v18 = vcombine.high %v644_v11, %v644_v11  ;;  %v661_v19 = vrot.slane %v286_v1, %v5410_v12 }
  0x82   : > { %v1290_v16 = vmax.f32 %v1288_v0, %v1289_v9  ;;  %v668_v22 = vrot.slane %v654_v3, %v5410_v12  ;;  %v1291_v23 = vsel %vm225_vm2, %v610_v50, -inf  ;;  %v1292_v24 = vsel %vm225_vm2, %v644_v11, -inf }
  0x83   : > { %v653_v21 = vcombine.high %v651_v15, %v651_v15  ;;  %v669_v26 = vcombine.high %v661_v19, %v661_v19  ;;  %v1293_v27 = vmax.f32 %v1291_v23, %v1292_v24  ;;  %v1300_v28 = vsel %vm225_vm2, %v618_v58, -inf }
  0x84   : > { %v1677_v25 = vsel %vm1655_vm9, %v1290_v16, %v1676_v17  ;;  %v670_v29 = vcombine.high %v668_v22, %v668_v22  ;;  %v1301_v30 = vsel %vm225_vm2, %v652_v18, -inf  ;;  %v1309_v31 = vsel %vm225_vm2, %v617_v51, -inf }
  0x85   : > { %1718 = vst.msk [vmem:[#allocation2 + $0x41] sm:$0xff] %vm223_vm1, %v1677_v25  ;;  %v1310_v32 = vsel %vm225_vm2, %v651_v15, -inf  ;;  %v1294_v33 = vrot.slane %v1293_v27, 4  ;;  %v1302_v34 = vmax.f32 %v1300_v28, %v1301_v30  ;;  %v1318_v36 = vsel %vm225_vm2, %v619_v59, -inf }
  0x86   : > { %v1311_v35 = vmax.f32 %v1309_v31, %v1310_v32  ;;  %v1319_v37 = vsel %vm225_vm2, %v653_v21, -inf  ;;  %v1327_v38 = vsel %vm225_vm2, %v627_v5, -inf  ;;  %v1328_v39 = vsel %vm225_vm2, %v661_v19, -inf  ;;  %v288_v31 = vld [vmem:[%s5405_s15 + $0xa8] sm:$0xff] }
  0x87   : > { %v1336_v40 = vsel %vm225_vm2, %v635_v13, -inf  ;;  %v1295_v41 = vmax.f32 %v1293_v27, %v1294_v33  ;;  %v1303_v42 = vrot.slane %v1302_v34, 4  ;;  %v1320_v44 = vmax.f32 %v1318_v36, %v1319_v37 }
  0x88   : > { %v1312_v43 = vrot.slane %v1311_v35, 4  ;;  %v1329_v45 = vmax.f32 %v1327_v38, %v1328_v39  ;;  %v1337_v46 = vsel %vm225_vm2, %v669_v26, -inf  ;;  %v1345_v47 = vsel %vm225_vm2, %v634_v6, -inf }
  0x89   : > { %v1346_v48 = vsel %vm225_vm2, %v668_v22, -inf  ;;  %v1296_v49 = vrot.slane %v1295_v41, 2  ;;  %v1304_v50 = vmax.f32 %v1302_v34, %v1303_v42  ;;  %v1321_v52 = vrot.slane %v1320_v44, 4  ;;  %v290_v42 = vld [vmem:[%s5405_s15 + $0xb8] sm:$0xff] }
  0x8a   : > { %v1313_v51 = vmax.f32 %v1311_v35, %v1312_v43  ;;  %v1330_v53 = vrot.slane %v1329_v45, 4  ;;  %v1338_v54 = vmax.f32 %v1336_v40, %v1337_v46  ;;  %v1347_v55 = vmax.f32 %v1345_v47, %v1346_v48  ;;  %v289_v40 = vld [vmem:[%s5405_s15 + $0xb0] sm:$0xff] }
  0x8b   : > { %v1354_v56 = vsel %vm225_vm2, %v636_v14, -inf  ;;  %v1297_v58 = vmax.f32 %v1295_v41, %v1296_v49  ;;  %v1305_v59 = vrot.slane %v1304_v50, 2  ;;  %v1322_v61 = vmax.f32 %v1320_v44, %v1321_v52  ;;  %v287_v14 = vld [vmem:[%s5405_s15 + $0xa0] sm:$0xff] }
  0x8c   : > { %v5606_v57 = vld [vmem:[#allocation2 + $0x40] sm:$0xff]  ;;  %v1314_v60 = vrot.slane %v1313_v51, 2  ;;  %v1331_v0 = vmax.f32 %v1329_v45, %v1330_v53  ;;  %v1339_v62 = vrot.slane %v1338_v54, 4  ;;  %v1348_v1 = vrot.slane %v1347_v55, 4 }
  0x8d   : > { %v5608_v63 = vld [vmem:[#allocation2 + $0x41] sm:$0xff]  ;;  %4875 = vmatprep.mubr.msk.f32.mxu0 %vm223_vm1, %v5606_v57  ;;  %v1355_v4 = vsel %vm225_vm2, %v670_v29, -inf  ;;  %v1298_v5 = vrot.slane %v1297_v58, 1  ;;  %v1306_v6 = vmax.f32 %v1304_v50, %v1305_v59  ;;  %v1323_v8 = vrot.slane %v1322_v61, 2 }
  0x8e   : > { %4889 = vmatprep.mubr.msk.f32.mxu1 %vm223_vm1, %v5608_v63  ;;  %v1315_v7 = vmax.f32 %v1313_v51, %v1314_v60  ;;  %v1332_v9 = vrot.slane %v1331_v0, 2  ;;  %v1340_v10 = vmax.f32 %v1338_v54, %v1339_v62  ;;  %v1349_v11 = vmax.f32 %v1347_v55, %v1348_v1 }
  0x8f   : > { %v1356_v13 = vmax.f32 %v1354_v56, %v1355_v4  ;;  %v1299_v15 = vmax.f32 %v1297_v58, %v1298_v5  ;;  %v1307_v3 = vrot.slane %v1306_v6, 1  ;;  %v1324_v17 = vmax.f32 %v1322_v61, %v1323_v8 }
  0x90   : > { %v1316_v16 = vrot.slane %v1315_v7, 1  ;;  %v1333_v18 = vmax.f32 %v1331_v0, %v1332_v9  ;;  %v1341_v19 = vrot.slane %v1340_v10, 2  ;;  %v1350_v21 = vrot.slane %v1349_v11, 2 }
  0x91   : > { %v1357_v22 = vrot.slane %v1356_v13, 4  ;;  %v1308_v23 = vmax.f32 %v1306_v6, %v1307_v3  ;;  %v1325_v25 = vrot.slane %v1324_v17, 1  ;;  %v671_v26 = vcombine.high %v287_v14, %v287_v14 }
  0x92   : > { %v1317_v24 = vmax.f32 %v1315_v7, %v1316_v16  ;;  %v1334_v27 = vrot.slane %v1333_v18, 1  ;;  %v1342_v28 = vmax.f32 %v1340_v10, %v1341_v19  ;;  %v1351_v29 = vmax.f32 %v1349_v11, %v1350_v21 }
  0x93   : > { %v1358_v30 = vmax.f32 %v1356_v13, %v1357_v22  ;;  %v1326_v32 = vmax.f32 %v1324_v17, %v1325_v25  ;;  %v1678_v33 = vsel %vm1643_vm3, %v1308_v23, %v1299_v15  ;;  %v678_v34 = vrot.slane %v287_v14, %v5410_v12 }
  0x94   : > { %v685_v35 = vrot.slane %v671_v26, %v5410_v12  ;;  %v1335_v36 = vmax.f32 %v1333_v18, %v1334_v27  ;;  %v1343_v37 = vrot.slane %v1342_v28, 1  ;;  %v1352_v38 = vrot.slane %v1351_v29, 1 }
  0x95   : > { %v1359_v39 = vrot.slane %v1358_v30, 2  ;;  %v1679_v41 = vsel %vm1645_vm4, %v1317_v24, %v1678_v33  ;;  %v686_v43 = vcombine.high %v678_v34, %v678_v34  ;;  %v688_v45 = vcombine.high %v288_v31, %v288_v31 }
  0x96   : > { %v687_v44 = vcombine.high %v685_v35, %v685_v35  ;;  %v1344_v46 = vmax.f32 %v1342_v28, %v1343_v37  ;;  %v1353_v47 = vmax.f32 %v1351_v29, %v1352_v38  ;;  %v1680_v49 = vsel %vm1647_vm5, %v1326_v32, %v1679_v41 }
  0x97   : > { %v1360_v48 = vmax.f32 %v1358_v30, %v1359_v39  ;;  %v1681_v50 = vsel %vm1649_vm6, %v1335_v36, %v1680_v49  ;;  %v695_v51 = vrot.slane %v288_v31, %v5410_v12  ;;  %v702_v52 = vrot.slane %v688_v45, %v5410_v12 }
  0x98   : > { %v705_v53 = vcombine.high %v289_v40, %v289_v40  ;;  %v1682_v55 = vsel %vm1651_vm7, %v1344_v46, %v1681_v50  ;;  %v712_v56 = vrot.slane %v289_v40, %v5410_v12  ;;  %v722_v58 = vcombine.high %v290_v42, %v290_v42 }
  0x99   : > { %v1361_v54 = vrot.slane %v1360_v48, 1  ;;  %v1683_v59 = vsel %vm1653_vm8, %v1353_v47, %v1682_v55  ;;  %v703_v60 = vcombine.high %v695_v51, %v695_v51  ;;  %v704_v61 = vcombine.high %v702_v52, %v702_v52 }
  0x9a   : > { %v719_v0 = vrot.slane %v705_v53, %v5410_v12  ;;  %v720_v1 = vcombine.high %v712_v56, %v712_v56  ;;  %v729_v4 = vrot.slane %v290_v42, %v5410_v12  ;;  %v736_v5 = vrot.slane %v722_v58, %v5410_v12 }
  0x9b   : > { %v1362_v62 = vmax.f32 %v1360_v48, %v1361_v54  ;;  %v1363_v7 = vsel %vm225_vm2, %v678_v34, -inf  ;;  %v1364_v8 = vsel %vm225_vm2, %v712_v56, -inf  ;;  %v1372_v9 = vsel %vm225_vm2, %v686_v43, -inf }
  0x9c   : > { %v721_v6 = vcombine.high %v719_v0, %v719_v0  ;;  %v737_v11 = vcombine.high %v729_v4, %v729_v4  ;;  %v738_v13 = vcombine.high %v736_v5, %v736_v5  ;;  %v1365_v14 = vmax.f32 %v1363_v7, %v1364_v8 }
  0x9d   : > { %v1684_v10 = vsel %vm1655_vm9, %v1362_v62, %v1683_v59  ;;  %v1373_v15 = vsel %vm225_vm2, %v720_v1, -inf  ;;  %v1381_v3 = vsel %vm225_vm2, %v685_v35, -inf  ;;  %v1382_v16 = vsel %vm225_vm2, %v719_v0, -inf  ;;  %v291_v0 = vld [vmem:[%s5405_s15 + $0xc0] sm:$0xff] }
  0x9e   : > { %1719 = vst.msk [vmem:[#allocation2 + $0x51] sm:$0xff] %vm223_vm1, %v1684_v10  ;;  %v1390_v17 = vsel %vm225_vm2, %v687_v44, -inf  ;;  %v1366_v18 = vrot.slane %v1365_v14, 4  ;;  %v1374_v19 = vmax.f32 %v1372_v9, %v1373_v15  ;;  %v1383_v21 = vmax.f32 %v1381_v3, %v1382_v16 }
  0x9f   : > { %v1391_v22 = vsel %vm225_vm2, %v721_v6, -inf  ;;  %v1399_v24 = vsel %vm225_vm2, %v695_v51, -inf  ;;  %v1400_v25 = vsel %vm225_vm2, %v729_v4, -inf  ;;  %v1408_v26 = vsel %vm225_vm2, %v703_v60, -inf }
  0xa0   : > { %v1392_v23 = vmax.f32 %v1390_v17, %v1391_v22  ;;  %v1367_v27 = vmax.f32 %v1365_v14, %v1366_v18  ;;  %v1375_v28 = vrot.slane %v1374_v19, 4  ;;  %v1384_v29 = vrot.slane %v1383_v21, 4  ;;  %v292_v18 = vld [vmem:[%s5405_s15 + $0xc8] sm:$0xff] }
  0xa1   : > { %v1401_v30 = vmax.f32 %v1399_v24, %v1400_v25  ;;  %v1409_v32 = vsel %vm225_vm2, %v737_v11, -inf  ;;  %v1417_v33 = vsel %vm225_vm2, %v702_v52, -inf  ;;  %v1418_v34 = vsel %vm225_vm2, %v736_v5, -inf }
  0xa2   : > { %v1393_v31 = vrot.slane %v1392_v23, 4  ;;  %v1368_v35 = vrot.slane %v1367_v27, 2  ;;  %v1376_v36 = vmax.f32 %v1374_v19, %v1375_v28  ;;  %v1385_v37 = vmax.f32 %v1383_v21, %v1384_v29  ;;  %v293_v28 = vld [vmem:[%s5405_s15 + $0xd0] sm:$0xff] }
  0xa3   : > { %v1402_v38 = vrot.slane %v1401_v30, 4  ;;  %v1410_v40 = vmax.f32 %v1408_v26, %v1409_v32  ;;  %v1419_v41 = vmax.f32 %v1417_v33, %v1418_v34  ;;  %v1426_v42 = vsel %vm225_vm2, %v704_v61, -inf }
  0xa4   : > { %v1394_v39 = vmax.f32 %v1392_v23, %v1393_v31  ;;  %v1369_v45 = vmax.f32 %v1367_v27, %v1368_v35  ;;  %v1377_v46 = vrot.slane %v1376_v36, 2  ;;  %v1386_v47 = vrot.slane %v1385_v37, 2 }
  0xa5   : > { %v5650_v43 = vld [vmem:[#allocation2 + $0x50] sm:$0xff]  ;;  %v1403_v48 = vmax.f32 %v1401_v30, %v1402_v38  ;;  %v1411_v50 = vrot.slane %v1410_v40, 4  ;;  %v1420_v51 = vrot.slane %v1419_v41, 4  ;;  %v1427_v52 = vsel %vm225_vm2, %v738_v13, -inf  ;;  %v294_v30 = vld [vmem:[%s5405_s15 + $0xd8] sm:$0xff] }
  0xa6   : > { %v5652_v44 = vld [vmem:[#allocation2 + $0x51] sm:$0xff]  ;;  %4876 = vmatmul.mubr.msk.f32.gmra.mxu0 %vm223_vm1, %v5650_v43  ;;  %v1395_v49 = vrot.slane %v1394_v39, 2  ;;  %v1370_v53 = vrot.slane %v1369_v45, 1  ;;  %v1378_v54 = vmax.f32 %v1376_v36, %v1377_v46  ;;  %v1387_v55 = vmax.f32 %v1385_v37, %v1386_v47 }
  0xa7   : > { %4890 = vmatmul.mubr.msk.f32.gmra.mxu1 %vm223_vm1, %v5652_v44  ;;  %v1404_v56 = vrot.slane %v1403_v48, 2  ;;  %v1412_v59 = vmax.f32 %v1410_v40, %v1411_v50  ;;  %v1421_v60 = vmax.f32 %v1419_v41, %v1420_v51  ;;  %v1428_v61 = vmax.f32 %v1426_v42, %v1427_v52 }
  0xa8   : > { %v1396_v58 = vmax.f32 %v1394_v39, %v1395_v49  ;;  %v1371_v62 = vmax.f32 %v1369_v45, %v1370_v53  ;;  %v1379_v1 = vrot.slane %v1378_v54, 1  ;;  %v1388_v4 = vrot.slane %v1387_v55, 1 }
  0xa9   : > { %v1405_v5 = vmax.f32 %v1403_v48, %v1404_v56  ;;  %v1413_v7 = vrot.slane %v1412_v59, 2  ;;  %v1422_v8 = vrot.slane %v1421_v60, 2  ;;  %v1429_v9 = vrot.slane %v1428_v61, 4 }
  0xaa   : > { %v1397_v6 = vrot.slane %v1396_v58, 1  ;;  %v1380_v10 = vmax.f32 %v1378_v54, %v1379_v1  ;;  %v1389_v11 = vmax.f32 %v1387_v55, %v1388_v4  ;;  %v739_v14 = vcombine.high %v291_v0, %v291_v0 }
  0xab   : > { %v1406_v13 = vrot.slane %v1405_v5, 1  ;;  %v1414_v3 = vmax.f32 %v1412_v59, %v1413_v7  ;;  %v1423_v16 = vmax.f32 %v1421_v60, %v1422_v8  ;;  %v1430_v17 = vmax.f32 %v1428_v61, %v1429_v9 }
  0xac   : > { %v1398_v15 = vmax.f32 %v1396_v58, %v1397_v6  ;;  %v1685_v21 = vsel %vm1643_vm3, %v1380_v10, %v1371_v62  ;;  %v746_v22 = vrot.slane %v291_v0, %v5410_v12  ;;  %v753_v23 = vrot.slane %v739_v14, %v5410_v12 }
  0xad   : > { %v1407_v19 = vmax.f32 %v1405_v5, %v1406_v13  ;;  %v1415_v24 = vrot.slane %v1414_v3, 1  ;;  %v1424_v25 = vrot.slane %v1423_v16, 1  ;;  %v1431_v26 = vrot.slane %v1430_v17, 2 }
  0xae   : > { %v1686_v27 = vsel %vm1645_vm4, %v1389_v11, %v1685_v21  ;;  %v754_v31 = vcombine.high %v746_v22, %v746_v22  ;;  %v755_v32 = vcombine.high %v753_v23, %v753_v23  ;;  %v756_v33 = vcombine.high %v292_v18, %v292_v18 }
  0xaf   : > { %v1687_v29 = vsel %vm1647_vm5, %v1398_v15, %v1686_v27  ;;  %v1416_v34 = vmax.f32 %v1414_v3, %v1415_v24  ;;  %v1425_v35 = vmax.f32 %v1423_v16, %v1424_v25  ;;  %v1432_v36 = vmax.f32 %v1430_v17, %v1431_v26 }
  0xb0   : > { %v1688_v37 = vsel %vm1649_vm6, %v1407_v19, %v1687_v29  ;;  %v763_v38 = vrot.slane %v292_v18, %v5410_v12  ;;  %v770_v39 = vrot.slane %v756_v33, %v5410_v12  ;;  %v773_v40 = vcombine.high %v293_v28, %v293_v28 }
  0xb1   : > { %v780_v41 = vrot.slane %v293_v28, %v5410_v12  ;;  %v1433_v42 = vrot.slane %v1432_v36, 1  ;;  %v1689_v45 = vsel %vm1651_vm7, %v1416_v34, %v1688_v37  ;;  %v790_v46 = vcombine.high %v294_v30, %v294_v30 }
  0xb2   : > { %v797_v47 = vrot.slane %v294_v30, %v5410_v12  ;;  %v1690_v48 = vsel %vm1653_vm8, %v1425_v35, %v1689_v45  ;;  %v771_v49 = vcombine.high %v763_v38, %v763_v38  ;;  %v772_v50 = vcombine.high %v770_v39, %v770_v39 }
  0xb3   : > { %v787_v51 = vrot.slane %v773_v40, %v5410_v12  ;;  %v1434_v52 = vmax.f32 %v1432_v36, %v1433_v42  ;;  %v788_v53 = vcombine.high %v780_v41, %v780_v41  ;;  %v804_v54 = vrot.slane %v790_v46, %v5410_v12 }
  0xb4   : > { %v805_v55 = vcombine.high %v797_v47, %v797_v47  ;;  %v1435_v58 = vsel %vm225_vm2, %v746_v22, -inf  ;;  %v1436_v59 = vsel %vm225_vm2, %v780_v41, -inf  ;;  %v1444_v60 = vsel %vm225_vm2, %v754_v31, -inf }
  0xb5   : > { %v789_v56 = vcombine.high %v787_v51, %v787_v51  ;;  %v1691_v61 = vsel %vm1655_vm9, %v1434_v52, %v1690_v48  ;;  %v806_v0 = vcombine.high %v804_v54, %v804_v54  ;;  %v1437_v62 = vmax.f32 %v1435_v58, %v1436_v59 }
  0xb6   : > { %v1445_v1 = vsel %vm225_vm2, %v788_v53, -inf  ;;  %1720 = vst.msk [vmem:[#allocation2 + $0x61] sm:$0xff] %vm223_vm1, %v1691_v61  ;;  %v1453_v5 = vsel %vm225_vm2, %v753_v23, -inf  ;;  %v1454_v6 = vsel %vm225_vm2, %v787_v51, -inf  ;;  %v1462_v7 = vsel %vm225_vm2, %v755_v32, -inf  ;;  %v295_v53 = vld [vmem:[%s5405_s15 + $0xe0] sm:$0xff] }
  0xb7   : > { %v1446_v4 = vmax.f32 %v1444_v60, %v1445_v1  ;;  %v1438_v8 = vrot.slane %v1437_v62, 4  ;;  %v1455_v9 = vmax.f32 %v1453_v5, %v1454_v6  ;;  %v1463_v10 = vsel %vm225_vm2, %v789_v56, -inf }
  0xb8   : > { %v1471_v11 = vsel %vm225_vm2, %v763_v38, -inf  ;;  %v1464_v14 = vmax.f32 %v1462_v7, %v1463_v10  ;;  %v1472_v15 = vsel %vm225_vm2, %v797_v47, -inf  ;;  %v1480_v3 = vsel %vm225_vm2, %v771_v49, -inf  ;;  %v296_v10 = vld [vmem:[%s5405_s15 + $0xe8] sm:$0xff] }
  0xb9   : > { %v1447_v13 = vrot.slane %v1446_v4, 4  ;;  %v1439_v16 = vmax.f32 %v1437_v62, %v1438_v8  ;;  %v1456_v17 = vrot.slane %v1455_v9, 4  ;;  %v1473_v18 = vmax.f32 %v1471_v11, %v1472_v15 }
  0xba   : > { %v1481_v19 = vsel %vm225_vm2, %v805_v55, -inf  ;;  %v1465_v22 = vrot.slane %v1464_v14, 4  ;;  %v1489_v24 = vsel %vm225_vm2, %v770_v39, -inf  ;;  %v1490_v28 = vsel %vm225_vm2, %v804_v54, -inf }
  0xbb   : > { %v1448_v21 = vmax.f32 %v1446_v4, %v1447_v13  ;;  %v1482_v23 = vmax.f32 %v1480_v3, %v1481_v19  ;;  %v1440_v25 = vrot.slane %v1439_v16, 2  ;;  %v1457_v26 = vmax.f32 %v1455_v9, %v1456_v17 }
  0xbc   : > { %v1474_v27 = vrot.slane %v1473_v18, 4  ;;  %v1466_v30 = vmax.f32 %v1464_v14, %v1465_v22  ;;  %v1491_v32 = vmax.f32 %v1489_v24, %v1490_v28  ;;  %v1498_v37 = vsel %vm225_vm2, %v772_v50, -inf }
  0xbd   : > { %v1449_v29 = vrot.slane %v1448_v21, 2  ;;  %v1483_v31 = vrot.slane %v1482_v23, 4  ;;  %v5693_v33 = vld [vmem:[#allocation2 + $0x60] sm:$0xff]  ;;  %v1441_v34 = vmax.f32 %v1439_v16, %v1440_v25  ;;  %v1458_v35 = vrot.slane %v1457_v26, 2 }
  0xbe   : > { %v1475_v36 = vmax.f32 %v1473_v18, %v1474_v27  ;;  %v5696_v38 = vld [vmem:[#allocation2 + $0x61] sm:$0xff]  ;;  %4878 = vmatprep.mubr.msk.f32.mxu0 %vm223_vm1, %v5693_v33  ;;  %v1467_v40 = vrot.slane %v1466_v30, 2  ;;  %v1492_v42 = vrot.slane %v1491_v32, 4  ;;  %v1499_v48 = vsel %vm225_vm2, %v806_v0, -inf  ;;  %v297_v18 = vld [vmem:[%s5405_s15 + $0xf0] sm:$0xff] }
  0xbf   : > { %v1450_v39 = vmax.f32 %v1448_v21, %v1449_v29  ;;  %v1484_v41 = vmax.f32 %v1482_v23, %v1483_v31  ;;  %4892 = vmatprep.mubr.msk.f32.mxu1 %vm223_vm1, %v5696_v38  ;;  %v1442_v45 = vrot.slane %v1441_v34, 1  ;;  %v1459_v46 = vmax.f32 %v1457_v26, %v1458_v35  ;;  %v298_v23 = vld [vmem:[%s5405_s15 + $0xf8] sm:$0xff]  ;;  %s5260_s15 = smov [#allocation4]  }
  0xc0   : > { %v1476_v47 = vrot.slane %v1475_v36, 2  ;;  %v1468_v50 = vmax.f32 %v1466_v30, %v1467_v40  ;;  %v1493_v52 = vmax.f32 %v1491_v32, %v1492_v42  ;;  %v1500_v58 = vmax.f32 %v1498_v37, %v1499_v48  ;;  %s5200_s16 = sshll.u32 %s5260_s15, 4  ;;  %s5201_s16 = int_to_ptr.vmem [resolvable:$false] %s5200_s16 }
  0xc1   : > { %v1451_v49 = vrot.slane %v1450_v39, 1  ;;  %v1485_v51 = vrot.slane %v1484_v41, 2  ;;  %v1443_v54 = vmax.f32 %v1441_v34, %v1442_v45  ;;  %v1460_v55 = vrot.slane %v1459_v46, 1  ;;  %s5202_s17 = scalar_lea.vmem %s5201_s16, 2048  ;;  %p5203_p0 = scmp.lt.s32.totalorder %s6200_s10, %s5201_s16 }
  0xc2   : > { %v1477_v56 = vmax.f32 %v1475_v36, %v1476_v47  ;;  %v1469_v60 = vrot.slane %v1468_v50, 1  ;;  %v1494_v62 = vrot.slane %v1493_v52, 2  ;;  %v1501_v5 = vrot.slane %v1500_v58, 4  ;;  %p5204_p1 = scmp.lt.s32.totalorder %s5202_s17, %s5196_s14 }
  0xc3   : > { %v1452_v59 = vmax.f32 %v1450_v39, %v1451_v49  ;;  %v1486_v61 = vmax.f32 %v1484_v41, %v1485_v51  ;;  %v1461_v1 = vmax.f32 %v1459_v46, %v1460_v55  ;;  %v807_v6 = vcombine.high %v295_v53, %v295_v53 }
  0xc4   : > { %v1478_v4 = vrot.slane %v1477_v56, 1  ;;  %v1470_v0 = vmax.f32 %v1468_v50, %v1469_v60  ;;  %v1495_v8 = vmax.f32 %v1493_v52, %v1494_v62  ;;  %v1502_v13 = vmax.f32 %v1500_v58, %v1501_v5  ;;  %p5205_p2 = por %p5204_p1, %p5203_p0 }
  0xc5   : > { %v1487_v7 = vrot.slane %v1486_v61, 1  ;;  %v1692_v9 = vsel %vm1643_vm3, %v1452_v59, %v1443_v54  ;;  %v814_v15 = vrot.slane %v295_v53, %v5410_v12  ;;  %v821_v19 = vrot.slane %v807_v6, %v5410_v12 }
  0xc6   : > { %v1479_v11 = vmax.f32 %v1477_v56, %v1478_v4  ;;  %v1693_v14 = vsel %vm1645_vm4, %v1461_v1, %v1692_v9  ;;  %v1496_v16 = vrot.slane %v1495_v8, 1  ;;  %v1503_v21 = vrot.slane %v1502_v13, 2  ;;  %p5206_p3 = pnand %p5205_p2, %p5199_p13 }
  0xc7   : > { %v1488_v3 = vmax.f32 %v1486_v61, %v1487_v7  ;;  %v1694_v17 = vsel %vm1647_vm5, %v1470_v0, %v1693_v14  ;;  %v822_v24 = vcombine.high %v814_v15, %v814_v15  ;;  %v824_v25 = vcombine.high %v296_v10, %v296_v10 }
  0xc8   : > { %v1695_v22 = vsel %vm1649_vm6, %v1479_v11, %v1694_v17  ;;  %v1497_v26 = vmax.f32 %v1495_v8, %v1496_v16  ;;  %v823_v28 = vcombine.high %v821_v19, %v821_v19  ;;  %v831_v29 = vrot.slane %v296_v10, %v5410_v12 }
  0xc9   : > { %v1696_v27 = vsel %vm1651_vm7, %v1488_v3, %v1695_v22  ;;  %v1504_v30 = vmax.f32 %v1502_v13, %v1503_v21  ;;  %v838_v31 = vrot.slane %v824_v25, %v5410_v12  ;;  %v841_v32 = vcombine.high %v297_v18, %v297_v18 }
  0xca   : > { %v848_v34 = vrot.slane %v297_v18, %v5410_v12  ;;  %v1697_v35 = vsel %vm1653_vm8, %v1497_v26, %v1696_v27  ;;  %v839_v36 = vcombine.high %v831_v29, %v831_v29  ;;  %v858_v37 = vcombine.high %v298_v23, %v298_v23  ;;  %v2030_v26 = vld [vmem:[#allocation2 + $0x2] sm:$0xff]  ;;  %v2180_v27 = vld [vmem:[#allocation2 + $0x10] sm:$0xff] }
  0xcb   : > { %v865_v39 = vrot.slane %v298_v23, %v5410_v12  ;;  %v1505_v40 = vrot.slane %v1504_v30, 1  ;;  %v840_v41 = vcombine.high %v838_v31, %v838_v31  ;;  %v855_v42 = vrot.slane %v841_v32, %v5410_v12 }
  0xcc   : > { %v856_v45 = vcombine.high %v848_v34, %v848_v34  ;;  %v872_v46 = vrot.slane %v858_v37, %v5410_v12  ;;  %v1507_v48 = vsel %vm225_vm2, %v814_v15, -inf  ;;  %v1508_v49 = vsel %vm225_vm2, %v848_v34, -inf }
  0xcd   : > { %v873_v47 = vcombine.high %v865_v39, %v865_v39  ;;  %v1506_v50 = vmax.f32 %v1504_v30, %v1505_v40  ;;  %v857_v51 = vcombine.high %v855_v42, %v855_v42  ;;  %v1509_v52 = vmax.f32 %v1507_v48, %v1508_v49 }
  0xce   : > { %v1516_v53 = vsel %vm225_vm2, %v822_v24, -inf  ;;  %v874_v54 = vcombine.high %v872_v46, %v872_v46  ;;  %v1517_v55 = vsel %vm225_vm2, %v856_v45, -inf  ;;  %v1525_v56 = vsel %vm225_vm2, %v821_v19, -inf }
  0xcf   : > { %v1526_v58 = vsel %vm225_vm2, %v855_v42, -inf  ;;  %v1698_v59 = vsel %vm1655_vm9, %v1506_v50, %v1697_v35  ;;  %v1510_v12 = vrot.slane %v1509_v52, 4  ;;  %v1518_v60 = vmax.f32 %v1516_v53, %v1517_v55 }
  0xd0   : > { %v1527_v61 = vmax.f32 %v1525_v56, %v1526_v58  ;;  %1721 = vst.msk [vmem:[#allocation2 + $0x71] sm:$0xff] %vm223_vm1, %v1698_v59  ;;  %v1534_v62 = vsel %vm225_vm2, %v823_v28, -inf  ;;  %v1535_v1 = vsel %vm225_vm2, %v857_v51, -inf  ;;  %v1543_v4 = vsel %vm225_vm2, %v831_v29, -inf }
  0xd1   : > { %v1544_v5 = vsel %vm225_vm2, %v865_v39, -inf  ;;  %v1511_v6 = vmax.f32 %v1509_v52, %v1510_v12  ;;  %v1519_v0 = vrot.slane %v1518_v60, 4  ;;  %v1536_v8 = vmax.f32 %v1534_v62, %v1535_v1  ;;  %v5753_v52 = vld [vmem:[#allocation2 + $0x22] sm:$0xff] }
  0xd2   : > { %v1528_v7 = vrot.slane %v1527_v61, 4  ;;  %v1545_v9 = vmax.f32 %v1543_v4, %v1544_v5  ;;  %v1552_v10 = vsel %vm225_vm2, %v839_v36, -inf  ;;  %v1553_v11 = vsel %vm225_vm2, %v873_v47, -inf  ;;  %v5751_v47 = vld [vmem:[#allocation2 + $0x20] sm:$0xff]  ;;  %v4587_v4 = vld [vmem:[%s6249_s1 + $0x18] sm:$0xf] }
  0xd3   : > { %v1561_v13 = vsel %vm225_vm2, %v838_v31, -inf  ;;  %v1512_v14 = vrot.slane %v1511_v6, 2  ;;  %v1520_v15 = vmax.f32 %v1518_v60, %v1519_v0  ;;  %v1537_v16 = vrot.slane %v1536_v8, 4  ;;  %v4597_v5 = vld [vmem:[%s6249_s1 + $0x1c] sm:$0xf]  ;;  %v5771_v0 = vld [vmem:[#allocation2 + $0x32] sm:$0xff] }
  0xd4   : > { %v1529_v3 = vmax.f32 %v1527_v61, %v1528_v7  ;;  %v1546_v17 = vrot.slane %v1545_v9, 4  ;;  %v1554_v18 = vmax.f32 %v1552_v10, %v1553_v11  ;;  %v1562_v19 = vsel %vm225_vm2, %v872_v46, -inf  ;;  %v5748_v46 = vld [vmem:[#allocation2 + $0x12] sm:$0xff] }
  0xd5   : > { %v1570_v21 = vsel %vm225_vm2, %v840_v41, -inf  ;;  %v1513_v22 = vmax.f32 %v1511_v6, %v1512_v14  ;;  %v1521_v23 = vrot.slane %v1520_v15, 2  ;;  %v1538_v25 = vmax.f32 %v1536_v8, %v1537_v16  ;;  %v5194_v6 = vld [vmem:[%s6249_s1 + $0x10] sm:$0xf] }
  0xd6   : > { %v1530_v24 = vrot.slane %v1529_v3, 2  ;;  %v1547_v28 = vmax.f32 %v1545_v9, %v1546_v17  ;;  %v1555_v29 = vrot.slane %v1554_v18, 4  ;;  %v1563_v30 = vmax.f32 %v1561_v13, %v1562_v19  ;;  %v5776_v9 = vld [vmem:[#allocation2 + $0x42] sm:$0xff]  ;;  %v5792_v19 = vld [vmem:[#allocation2 + $0x52] sm:$0xff] }
  0xd7   : > { %v1571_v31 = vsel %vm225_vm2, %v874_v54, -inf  ;;  %v5739_v32 = vld [vmem:[#allocation2 + $0x70] sm:$0xff]  ;;  %v1514_v35 = vrot.slane %v1513_v22, 1  ;;  %v1522_v36 = vmax.f32 %v1520_v15, %v1521_v23  ;;  %v1539_v39 = vrot.slane %v1538_v25, 2 }
  0xd8   : > { %v5741_v34 = vld [vmem:[#allocation2 + $0x71] sm:$0xff]  ;;  %v1531_v37 = vmax.f32 %v1529_v3, %v1530_v24  ;;  %4879 = vmatmul.mubr.msk.f32.gmra.mxu0 %vm223_vm1, %v5739_v32  ;;  %v1548_v40 = vrot.slane %v1547_v28, 2  ;;  %v1556_v41 = vmax.f32 %v1554_v18, %v1555_v29  ;;  %v1564_v42 = vrot.slane %v1563_v30, 4 }
  0xd9   : > { %4893 = vmatmul.mubr.msk.f32.gmra.mxu1 %vm223_vm1, %v5741_v34  ;;  %v1572_v45 = vmax.f32 %v1570_v21, %v1571_v31  ;;  %4897 = vmatprep.mubr.msk.f32.mxu0 %vm223_vm1, %v2030_v26  ;;  %v1515_v48 = vmax.f32 %v1513_v22, %v1514_v35  ;;  %v1523_v49 = vrot.slane %v1522_v36, 1  ;;  %v1540_v51 = vmax.f32 %v1538_v25, %v1539_v39  ;;  %v5195_v15 = vld [vmem:[%s6249_s1 + $0x14] sm:$0xf]  ;;  %v5797_v22 = vld [vmem:[#allocation2 + $0x62] sm:$0xff] }
  0xda   : > { %4911 = vmatprep.mubr.msk.f32.mxu1 %vm223_vm1, %v2180_v27  ;;  %v1532_v50 = vrot.slane %v1531_v37, 1  ;;  %v1549_v53 = vmax.f32 %v1547_v28, %v1548_v40  ;;  %v1557_v54 = vrot.slane %v1556_v41, 2  ;;  %v1565_v55 = vmax.f32 %v1563_v30, %v1564_v42  ;;  %v2037_v27 = vld [vmem:[#allocation2 + $0x72] sm:$0xff]  ;;  %v2331_v30 = vld [vmem:[#allocation2 + $0x21] sm:$0xff] }
  0xdb   : > { %v1573_v56 = vrot.slane %v1572_v45, 4  ;;  %v1524_v58 = vmax.f32 %v1522_v36, %v1523_v49  ;;  %v1541_v12 = vrot.slane %v1540_v51, 1  ;;  %v2330_v29 = vld [vmem:[#allocation2 + $0x11] sm:$0xff]  ;;  %v4607_v35 = vld [vmem:[%s6249_s1 + $0x20] sm:$0xf] }
  0xdc   : > { %v1533_v59 = vmax.f32 %v1531_v37, %v1532_v50  ;;  %4898 = vmatmul.mubr.msk.f32.vlgmr.msra.gmra.mxu0 %vm223_vm1, %v5748_v46  ;;  %v1550_v60 = vrot.slane %v1549_v53, 1  ;;  %v1558_v61 = vmax.f32 %v1556_v41, %v1557_v54  ;;  %v1566_v62 = vrot.slane %v1565_v55, 2  ;;  %v2332_v31 = vld [vmem:[#allocation2 + $0x31] sm:$0xff]  ;;  %v2633_v40 = vld [vmem:[#allocation2 + $0x40] sm:$0xff] }
  0xdd   : > { %4912 = vmatmul.mubr.msk.f32.vlgmr.msra.gmra.mxu1 %vm223_vm1, %v5751_v47  ;;  %v1574_v1 = vmax.f32 %v1572_v45, %v1573_v56  ;;  %4924 = vmatpush3.msk.msra.mxu0 %vm1763_vm0, %v5194_v6  ;;  %v1542_v7 = vmax.f32 %v1540_v51, %v1541_v12  ;;  %v1699_v8 = vsel %vm1643_vm3, %v1524_v58, %v1515_v48  ;;  %v2632_v39 = vld [vmem:[#allocation2 + $0x30] sm:$0xff] }
  0xde   : > { %4900 = vmatprep.mubr.msk.f32.mxu0 %vm223_vm1, %v5753_v52  ;;  %4914 = vmatprep.mubr.msk.f32.mxu1 %vm223_vm1, %v5566_v20  ;;  %v1551_v10 = vmax.f32 %v1549_v53, %v1550_v60  ;;  %v1559_v11 = vrot.slane %v1558_v61, 1  ;;  %v1567_v13 = vmax.f32 %v1565_v55, %v1566_v62  ;;  %v1700_v3 = vsel %vm1645_vm4, %v1533_v59, %v1699_v8  ;;  %v2638_v42 = vld [vmem:[#allocation2 + $0x90] sm:$0xff] }
  0xdf   : > { %v1575_v14 = vrot.slane %v1574_v1, 2  ;;  %4938 = vmatpush3.msk.msra.mxu1 %vm1763_vm0, %v5195_v15  ;;  %4951 = vmatprep.subr.msk.mxu0 %vm1763_vm0, %v4587_v4  ;;  %v1701_v18 = vsel %vm1647_vm5, %v1542_v7, %v1700_v3 }
  0xe0   : > { %4965 = vmatprep.subr.msk.mxu1 %vm1763_vm0, %v4597_v5  ;;  %4901 = vmatmul.mubr.msk.f32.gmra.mxu0 %vm223_vm1, %v5771_v0  ;;  %v1560_v20 = vmax.f32 %v1558_v61, %v1559_v11  ;;  %v1568_v16 = vrot.slane %v1567_v13, 1  ;;  %v1702_v21 = vsel %vm1649_vm6, %v1551_v10, %v1701_v18  ;;  %v4527_v18 = vld [vmem:[%s6250_s2] ss:$0 sm:$0xff] }
  0xe1   : > { %4915 = vmatmul.mubr.msk.f32.gmra.mxu1 %vm223_vm1, %v5606_v57  ;;  %v1576_v17 = vmax.f32 %v1574_v1, %v1575_v14  ;;  %4903 = vmatprep.mubr.msk.f32.mxu0 %vm223_vm1, %v5776_v9 }
  0xe2   : > { %4917 = vmatprep.mubr.msk.f32.mxu1 %vm223_vm1, %v5650_v43  ;;  %v1569_v23 = vmax.f32 %v1567_v13, %v1568_v16  ;;  %v1703_v57 = vsel %vm1651_vm7, %v1560_v20, %v1702_v21 }
  0xe3   : > { %v1577_v24 = vrot.slane %v1576_v17, 1 }
  0xe4   : > { %4904 = vmatmul.mubr.msk.f32.gmra.mxu0 %vm223_vm1, %v5792_v19  ;;  %v1704_v26 = vsel %vm1653_vm8, %v1569_v23, %v1703_v57 }
  0xe5   : > { %4918 = vmatmul.mubr.msk.f32.gmra.mxu1 %vm223_vm1, %v5693_v33  ;;  %v1578_v25 = vmax.f32 %v1576_v17, %v1577_v24  ;;  %4906 = vmatprep.mubr.msk.f32.mxu0 %vm223_vm1, %v5797_v22 }
  0xe6   : > { %4920 = vmatprep.mubr.msk.f32.mxu1 %vm223_vm1, %v5739_v32 }
  0xe7   : > { %v1705_v28 = vsel %vm1655_vm9, %v1578_v25, %v1704_v26 }
  0xe8   : > { %1722 = vst.msk [vmem:[#allocation2 + $0x81] sm:$0xff] %vm223_vm1, %v1705_v28  ;;  %4907 = vmatmul.mubr.msk.f32.gmra.mxu0 %vm223_vm1, %v2037_v27 }
  0xe9   : > { %4925 = vmatprep.mubr.msk.f32.mxu0 %vm223_vm1, %v2330_v29 }
  0xec   : > { %4926 = vmatmul.mubr.msk.f32.vlgmr.msra.gmra.mxu0 %vm223_vm1, %v2331_v30 }
  0xed   : > { %4952 = vmatpush3.msk.msra.mxu0 %vm1763_vm0, %v4587_v4  ;;  %4928 = vmatprep.mubr.msk.f32.mxu0 %vm223_vm1, %v2332_v31 }
  0xee   : > { %4979 = vmatprep.subr.msk.mxu0 %vm1763_vm0, %v4607_v35 }
  0xef   : > { %v2187_v36 = vld [vmem:[#allocation2 + $0x80] sm:$0xff] }
  0xf0   : > { %4921 = vmatmul.mubr.msk.f32.gmra.mxu1 %vm223_vm1, %v2187_v36  ;;  %4929 = vmatmul.mubr.msk.f32.gmra.mxu0 %vm223_vm1, %v5608_v63  ;;  %v2337_v37 = vld [vmem:[#allocation2 + $0x81] sm:$0xff] }
  0xf1   : > { %4939 = vmatprep.mubr.msk.f32.mxu1 %vm223_vm1, %v5748_v46  ;;  %4931 = vmatprep.mubr.msk.f32.mxu0 %vm223_vm1, %v5652_v44  ;;  %v2487_v41 = vld [vmem:[#allocation2 + $0x82] sm:$0xff] }
  0xf4   : > { %4940 = vmatmul.mubr.msk.f32.vlgmr.msra.gmra.mxu1 %vm223_vm1, %v5753_v52  ;;  %4932 = vmatmul.mubr.msk.f32.gmra.mxu0 %vm223_vm1, %v5696_v38 }
  0xf5   : > { %4942 = vmatprep.mubr.msk.f32.mxu1 %vm223_vm1, %v5771_v0  ;;  %4934 = vmatprep.mubr.msk.f32.mxu0 %vm223_vm1, %v5741_v34 }
  0xf6   : > { %4966 = vmatpush3.msk.msra.mxu1 %vm1763_vm0, %v4597_v5 }
  0xf8   : > { %4943 = vmatmul.mubr.msk.f32.gmra.mxu1 %vm223_vm1, %v5776_v9  ;;  %4935 = vmatmul.mubr.msk.f32.gmra.mxu0 %vm223_vm1, %v2337_v37 }
  0xf9   : > { %4945 = vmatprep.mubr.msk.f32.mxu1 %vm223_vm1, %v5792_v19  ;;  %4953 = vmatprep.mubr.msk.f32.mxu0 %vm223_vm1, %v5751_v47 }
  0xfc   : > { %4946 = vmatmul.mubr.msk.f32.gmra.mxu1 %vm223_vm1, %v5797_v22  ;;  %4954 = vmatmul.mubr.msk.f32.vlgmr.msra.gmra.mxu0 %vm223_vm1, %v2632_v39 }
  0xfd   : > { %4948 = vmatprep.mubr.msk.f32.mxu1 %vm223_vm1, %v2037_v27  ;;  %4980 = vmatpush3.msk.msra.mxu0 %vm1763_vm0, %v4607_v35 }
  0xfe   : > { %4956 = vmatprep.mubr.msk.f32.mxu0 %vm223_vm1, %v2633_v40 }
 0x100   : > { %4949 = vmatmul.mubr.msk.f32.gmra.mxu1 %vm223_vm1, %v2487_v41  ;;  %4957 = vmatmul.mubr.msk.f32.gmra.mxu0 %vm223_vm1, %v5650_v43  ;;  %v2938_v43 = vld [vmem:[#allocation2 + $0x92] sm:$0xff] }
 0x101   : > { %4967 = vmatprep.mubr.msk.f32.mxu1 %vm223_vm1, %v2331_v30  ;;  %4959 = vmatprep.mubr.msk.f32.mxu0 %vm223_vm1, %v5693_v33  ;;  %v4626_v33 = vld [vmem:[%s6251_s3 + $0x8] sm:$0xff] }
 0x102   : > { %5007 = vmatprep.subr.mxu0 %v4626_v33 }
 0x103   : > { %v4871_v45 = vpop.f32.mrf.mxu0 }
 0x104   : > { %4968 = vmatmul.mubr.msk.f32.vlgmr.msra.gmra.mxu1 %vm223_vm1, %v2332_v31  ;;  %4960 = vmatmul.mubr.msk.f32.gmra.mxu0 %vm223_vm1, %v5739_v32  ;;  %v3251_v32 = vld [vmem:[#allocation3 + $0x1] sm:$0xff]  ;;  %v4885_v46 = vpop.f32.mrf.mxu1  ;;  %v1873_v23 = vadd.f32 %v4871_v45, %v4527_v18 }
 0x105   : > { %4970 = vmatprep.mubr.msk.f32.mxu1 %vm223_vm1, %v5608_v63  ;;  %4962 = vmatprep.mubr.msk.f32.mxu0 %vm223_vm1, %v2187_v36  ;;  %v2788_v63 = vld [vmem:[#allocation2 + $0x91] sm:$0xff]  ;;  %v1833_v47 = vpop.f32.mrf.mxu0 }
 0x106   : > { %v1983_v48 = vpop.f32.mrf.mxu1  ;;  %v1872_v25 = vadd.f32 %v4527_v18, %v1833_v47  ;;  %v2023_v28 = vadd.f32 %v4885_v46, %v1873_v23 }
 0x108   : > { %4971 = vmatmul.mubr.msk.f32.gmra.mxu1 %vm223_vm1, %v5652_v44  ;;  %4963 = vmatmul.mubr.msk.f32.gmra.mxu0 %vm223_vm1, %v2638_v42  ;;  %v3113_v44 = vld [vmem:[%s6251_s3] sm:$0xff]  ;;  %v2022_v35 = vadd.f32 %v1983_v48, %v1872_v25 }
 0x109   : > { %4973 = vmatprep.mubr.msk.f32.mxu1 %vm223_vm1, %v5696_v38  ;;  %4981 = vmatprep.mubr.msk.f32.mxu0 %vm223_vm1, %v5753_v52  ;;  %v3105_v38 = vld [vmem:[#allocation3] sm:$0xff] }
 0x10a   : > { %4993 = vmatprep.subr.mxu1 %v3113_v44 }
 0x10b   : > { %4994 = vmatpush3.msra.mxu1 %v3113_v44 }
 0x10c   : > { %4974 = vmatmul.mubr.msk.f32.gmra.mxu1 %vm223_vm1, %v5741_v34  ;;  %4982 = vmatmul.mubr.msk.f32.vlgmr.msra.gmra.mxu0 %vm223_vm1, %v5771_v0  ;;  %v5933_v34 = vld [vmem:[%s6251_s3 + $0x10] sm:$0xff] }
 0x10d   : > { %4976 = vmatprep.mubr.msk.f32.mxu1 %vm223_vm1, %v2337_v37  ;;  %4984 = vmatprep.mubr.msk.f32.mxu0 %vm223_vm1, %v5776_v9  ;;  %6258 = vst [vmem:[#allocation7_spill] sm:$0xff] %v5933_v34 }
 0x10e   : > { %5008 = vmatpush3.msra.mxu0 %v4626_v33  ;;  %5021 = vmatprep.subr.mxu1 %v5933_v34 }
 0x10f   : > { %5035 = vmatprep.subr.mxu0 %v5940_v2 }
 0x110   : > { %4977 = vmatmul.mubr.msk.f32.gmra.mxu1 %vm223_vm1, %v2788_v63  ;;  %4985 = vmatmul.mubr.msk.f32.gmra.mxu0 %vm223_vm1, %v5792_v19 }
 0x111   : > { %4987 = vmatprep.mubr.msk.f32.mxu0 %vm223_vm1, %v5797_v22  ;;  %4995 = vmatprep.mubr.msk.f32.mxu1 %vm245_vm10, %v3105_v38 }
 0x114   : > { %4988 = vmatmul.mubr.msk.f32.gmra.mxu0 %vm223_vm1, %v2037_v27 }
 0x115   : > { %4990 = vmatprep.mubr.msk.f32.mxu0 %vm223_vm1, %v2487_v41 }
 0x118   : > { %4991 = vmatmul.mubr.msk.f32.gmra.mxu0 %vm223_vm1, %v2938_v43 }
 0x119   : > { %5009 = vmatprep.mubr.msk.f32.mxu0 %vm245_vm10, %v3251_v32 }
 0x135   : > { %v4874_v49 = vpop.f32.mrf.mxu0 }
 0x136   : > { %v4888_v50 = vpop.f32.mrf.mxu1  ;;  %v1875_v29 = vadd.f32 %v4874_v49, %v4527_v18 }
 0x137   : > { %v1843_v51 = vpop.f32.mrf.mxu0 }
 0x138   : > { %v1993_v52 = vpop.f32.mrf.mxu1  ;;  %v1874_v36 = vadd.f32 %v4527_v18, %v1843_v51  ;;  %v2025_v41 = vadd.f32 %v4888_v50, %v1875_v29 }
 0x13a   : > { %v2024_v38 = vadd.f32 %v1993_v52, %v1874_v36 }
 0x166   : > { %v4877_v53 = vpop.f32.mrf.mxu0 }
 0x167   : > { %v4891_v54 = vpop.f32.mrf.mxu1  ;;  %v1877_v42 = vadd.f32 %v4877_v53, %v4527_v18 }
 0x168   : > { %v1853_v55 = vpop.f32.mrf.mxu0 }
 0x169   : > { %v2003_v56 = vpop.f32.mrf.mxu1  ;;  %v1876_v44 = vadd.f32 %v4527_v18, %v1853_v55  ;;  %v2027_v23 = vadd.f32 %v4891_v54, %v1877_v42 }
 0x198   : > { %v4880_v58 = vpop.f32.mrf.mxu0 }
 0x199   : > { %v5943_v59 = vpop.f32.mrf.mxu1  ;;  %v1879_v46 = vadd.f32 %v4880_v58, %v4527_v18 }
 0x19a   : > { %v1863_v12 = vpop.f32.mrf.mxu0 }
 0x19b   : > { %v5945_v60 = vpop.f32.mrf.mxu1  ;;  %v1878_v25 = vadd.f32 %v4527_v18, %v1863_v12  ;;  %v2029_v55 = vadd.f32 %v5943_v59, %v1879_v46 }
 0x19c   : > { %v4899_v61 = vpop.f32.mrf.mxu0 }
 0x19d   : > { %v4913_v62 = vpop.f32.mrf.mxu1  ;;  %v2173_v37 = vadd.f32 %v4899_v61, %v2023_v28  ;;  %v2026_v61 = vadd.f32 %v2003_v56, %v1876_v44  ;;  %v2028_v54 = vadd.f32 %v5945_v60, %v1878_v25 }
 0x19e   : > { %v2133_v1 = vpop.f32.mrf.mxu0 }
 0x19f   : > { %v2283_v4 = vpop.f32.mrf.mxu1  ;;  %v2172_v63 = vadd.f32 %v2133_v1, %v2022_v35  ;;  %v2323_v32 = vadd.f32 %v4913_v62, %v2173_v37 }
 0x1a0   : > { %v4902_v5 = vpop.f32.mrf.mxu0 }
 0x1a1   : > { %v4916_v6 = vpop.f32.mrf.mxu1  ;;  %v2175_v45 = vadd.f32 %v4902_v5, %v2025_v41  ;;  %v2322_v2 = vadd.f32 %v2283_v4, %v2172_v63 }
 0x1a2   : > { %v2143_v0 = vpop.f32.mrf.mxu0 }
 0x1a3   : > { %v2293_v7 = vpop.f32.mrf.mxu1  ;;  %v2174_v34 = vadd.f32 %v2143_v0, %v2024_v38  ;;  %v2325_v50 = vadd.f32 %v4916_v6, %v2175_v45 }
 0x1a4   : > { %v4905_v8 = vpop.f32.mrf.mxu0 }
 0x1a5   : > { %v4919_v10 = vpop.f32.mrf.mxu1  ;;  %v2177_v53 = vadd.f32 %v4905_v8, %v2027_v23  ;;  %v2324_v5 = vadd.f32 %v2293_v7, %v2174_v34 }
 0x1a6   : > { %v2153_v9 = vpop.f32.mrf.mxu0 }
 0x1a7   : > { %v5949_v14 = vpop.f32.mrf.mxu1  ;;  %v2176_v52 = vadd.f32 %v2153_v9, %v2026_v61 }
 0x1a8   : > { %v4908_v11 = vpop.f32.mrf.mxu0 }
 0x1a9   : > { %v2179_v4 = vadd.f32 %v4908_v11, %v2029_v55 }
 0x1aa   : > { %v5947_v13 = vpop.f32.mrf.mxu0 }
 0x1ab   : > { %v2178_v8 = vadd.f32 %v5947_v13, %v2028_v54 }
 0x1ac   : > { %v4927_v15 = vpop.f32.mrf.mxu0 }
 0x1ad   : > { %v2473_v48 = vadd.f32 %v4927_v15, %v2323_v32  ;;  %v2327_v15 = vadd.f32 %v4919_v10, %v2177_v53 }
 0x1ae   : > { %v2433_v3 = vpop.f32.mrf.mxu0 }
 0x1af   : > { %v2472_v1 = vadd.f32 %v2433_v3, %v2322_v2  ;;  %v2326_v2 = vadd.f32 %v5949_v14, %v2176_v52 }
 0x1b0   : > { %v5951_v20 = vpop.f32.mrf.mxu1  ;;  %v4930_v16 = vpop.f32.mrf.mxu0 }
 0x1b1   : > { %v2475_v58 = vadd.f32 %v4930_v16, %v2325_v50  ;;  %v2329_v16 = vadd.f32 %v5951_v20, %v2179_v4 }
 0x1b2   : > { %v5953_v17 = vpop.f32.mrf.mxu1  ;;  %v2443_v19 = vpop.f32.mrf.mxu0 }
 0x1b3   : > { %v2474_v12 = vadd.f32 %v2443_v19, %v2324_v5  ;;  %v2328_v19 = vadd.f32 %v5953_v17, %v2178_v8 }
 0x1b4   : > { %v4941_v21 = vpop.f32.mrf.mxu1  ;;  %v4933_v22 = vpop.f32.mrf.mxu0 }
 0x1b5   : > { %v2623_v35 = vadd.f32 %v4941_v21, %v2473_v48  ;;  %v2477_v3 = vadd.f32 %v4933_v22, %v2327_v15 }
 0x1b6   : > { %v2583_v24 = vpop.f32.mrf.mxu1  ;;  %v2453_v57 = vpop.f32.mrf.mxu0 }
 0x1b7   : > { %v2622_v56 = vadd.f32 %v2583_v24, %v2472_v1  ;;  %v2476_v21 = vadd.f32 %v2453_v57, %v2326_v2  ;;  %v6260_v2 = vld [vmem:[#allocation7_spill] sm:$0xff] }
 0x1b8   : > { %v4944_v26 = vpop.f32.mrf.mxu1  ;;  %v5958_v27 = vpop.f32.mrf.mxu0 }
 0x1b9   : > { %v2625_v9 = vadd.f32 %v4944_v26, %v2475_v58 }
 0x1ba   : > { %v2593_v30 = vpop.f32.mrf.mxu1  ;;  %v5960_v31 = vpop.f32.mrf.mxu0 }
 0x1bb   : > { %v2624_v11 = vadd.f32 %v2593_v30, %v2474_v12  ;;  %v2478_v63 = vadd.f32 %v5960_v31, %v2328_v19 }
 0x1bc   : > { %v4947_v39 = vpop.f32.mrf.mxu1  ;;  %v4955_v40 = vpop.f32.mrf.mxu0 }
 0x1bd   : > { %v2774_v18 = vadd.f32 %v4955_v40, %v2623_v35  ;;  %v2479_v40 = vadd.f32 %v5958_v27, %v2329_v16  ;;  %v2627_v41 = vadd.f32 %v4947_v39, %v2477_v3 }
 0x1be   : > { %v2603_v43 = vpop.f32.mrf.mxu1  ;;  %v2734_v33 = vpop.f32.mrf.mxu0 }
 0x1bf   : > { %v2773_v34 = vadd.f32 %v2734_v33, %v2622_v56  ;;  %v2626_v22 = vadd.f32 %v2603_v43, %v2476_v21 }
 0x1c0   : > { %v4950_v47 = vpop.f32.mrf.mxu1  ;;  %v4958_v49 = vpop.f32.mrf.mxu0 }
 0x1c1   : > { %v2776_v10 = vadd.f32 %v4958_v49, %v2625_v9  ;;  %v2629_v32 = vadd.f32 %v4950_v47, %v2479_v40  ;;  %v6261_v9 = vld [vmem:[#allocation8_spill] sm:$0xff] }
 0x1c2   : > { %v2613_v51 = vpop.f32.mrf.mxu1  ;;  %v2744_v28 = vpop.f32.mrf.mxu0 }
 0x1c3   : > { %v2775_v42 = vadd.f32 %v2744_v28, %v2624_v11  ;;  %v2628_v49 = vadd.f32 %v2613_v51, %v2478_v63 }
 0x1c4   : > { %v4969_v29 = vpop.f32.mrf.mxu1  ;;  %v4961_v62 = vpop.f32.mrf.mxu0 }
 0x1c5   : > { %v2924_v37 = vadd.f32 %v4969_v29, %v2774_v18  ;;  %v2778_v33 = vadd.f32 %v4961_v62, %v2627_v41  ;;  %v4653_v18 = vld [vmem:[%s6251_s3 + $0x20] sm:$0xff]  ;;  %v4671_v41 = vld [vmem:[%s6251_s3 + $0x30] sm:$0xff] }
 0x1c6   : > { %v2884_v36 = vpop.f32.mrf.mxu1  ;;  %v2754_v0 = vpop.f32.mrf.mxu0 }
 0x1c7   : > { %v2923_v13 = vadd.f32 %v2884_v36, %v2773_v34  ;;  %v2777_v17 = vadd.f32 %v2754_v0, %v2626_v22 }
 0x1c8   : > { %v4972_v6 = vpop.f32.mrf.mxu1  ;;  %v4964_v59 = vpop.f32.mrf.mxu0 }
 0x1c9   : > { %v2926_v57 = vadd.f32 %v4972_v6, %v2776_v10  ;;  %v2780_v61 = vadd.f32 %v4964_v59, %v2629_v32  ;;  %v4662_v6 = vld [vmem:[%s6251_s3 + $0x28] sm:$0xff]  ;;  %v4141_v32 = vld [vmem:[#allocation3 + $0x91] sm:$0xff] }
 0x1ca   : > { %v2894_v7 = vpop.f32.mrf.mxu1  ;;  %v2764_v60 = vpop.f32.mrf.mxu0  ;;  %v3398_v10 = vld [vmem:[#allocation3 + $0x2] sm:$0xff] }
 0x1cb   : > { %v2925_v46 = vadd.f32 %v2894_v7, %v2775_v42  ;;  %v2779_v53 = vadd.f32 %v2764_v60, %v2628_v49 }
 0x1cc   : > { %v4975_v24 = vpop.f32.mrf.mxu1  ;;  %v4983_v14 = vpop.f32.mrf.mxu0 }
 0x1cd   : > { %v3074_v26 = vadd.f32 %v4983_v14, %v2924_v37  ;;  %v2928_v43 = vadd.f32 %v4975_v24, %v2778_v33 }
 0x1ce   : > { %v2904_v44 = vpop.f32.mrf.mxu1  ;;  %v3034_v20 = vpop.f32.mrf.mxu0 }
 0x1cf   : > { %v3082_v30 = vmax.f32 %v3074_v26, 0.0  ;;  %v3073_v38 = vadd.f32 %v3034_v20, %v2923_v13  ;;  %v2927_v50 = vadd.f32 %v2904_v44, %v2777_v17  ;;  %v4680_v13 = vld [vmem:[%s6251_s3 + $0x38] sm:$0xff] }
 0x1d0   : > { %v4986_v45 = vpop.f32.mrf.mxu0  ;;  %v4978_v23 = vpop.f32.mrf.mxu1 }
 0x1d1   : > { %3091 = vst.msk [vmem:[#allocation3 + $0x21] sm:$0xff] %vm245_vm10, %v3082_v30  ;;  %v3081_v27 = vmax.f32 %v3073_v38, 0.0  ;;  %v3076_v39 = vadd.f32 %v4986_v45, %v2926_v57  ;;  %v2930_v52 = vadd.f32 %v4978_v23, %v2780_v61  ;;  %v4689_v57 = vld [vmem:[%s6251_s3 + $0x40] sm:$0xff]  ;;  %v3994_v38 = vld [vmem:[#allocation3 + $0x90] sm:$0xff] }
 0x1d2   : > { %v3044_v48 = vpop.f32.mrf.mxu0  ;;  %v2914_v29 = vpop.f32.mrf.mxu1  ;;  %v4288_v45 = vld [vmem:[#allocation3 + $0x92] sm:$0xff] }
 0x1d3   : > { %3090 = vst.msk [vmem:[#allocation3 + $0x11] sm:$0xff] %vm245_vm10, %v3081_v27  ;;  %v3084_v31 = vmax.f32 %v3076_v39, 0.0  ;;  %v3075_v25 = vadd.f32 %v3044_v48, %v2925_v46  ;;  %v2929_v35 = vadd.f32 %v2914_v29, %v2779_v53 }
 0x1d4   : > { %v4989_v28 = vpop.f32.mrf.mxu0 }
 0x1d5   : > { %3093 = vst.msk [vmem:[#allocation3 + $0x41] sm:$0xff] %vm245_vm10, %v3084_v31  ;;  %v3083_v47 = vmax.f32 %v3075_v25, 0.0  ;;  %v3078_v1 = vadd.f32 %v4989_v28, %v2928_v43 }
 0x1d6   : > { %v3054_v55 = vpop.f32.mrf.mxu0 }
 0x1d7   : > { %3092 = vst.msk [vmem:[#allocation3 + $0x31] sm:$0xff] %vm245_vm10, %v3083_v47  ;;  %v3086_v51 = vmax.f32 %v3078_v1, 0.0  ;;  %v3077_v62 = vadd.f32 %v3054_v55, %v2927_v50 }
 0x1d8   : > { %v4992_v5 = vpop.f32.mrf.mxu0  ;;  %v5981_v12 = vld [vmem:[#allocation3 + $0x20] sm:$0xff] }
 0x1d9   : > { %3095 = vst.msk [vmem:[#allocation3 + $0x61] sm:$0xff] %vm245_vm10, %v3086_v51  ;;  %v3085_v58 = vmax.f32 %v3077_v62, 0.0  ;;  %v3080_v36 = vadd.f32 %v4992_v5, %v2930_v52  ;;  %v5992_v8 = vld [vmem:[#allocation3 + $0x21] sm:$0xff] }
 0x1da   : > { %v3064_v54 = vpop.f32.mrf.mxu0  ;;  %v3106_v4 = vld [vmem:[#allocation3 + $0x10] sm:$0xff]  ;;  %v6044_v14 = vld [vmem:[#allocation3 + $0x22] sm:$0xff] }
 0x1db   : > { %v5975_v0 = vld [vmem:[#allocation3 + $0x11] sm:$0xff]  ;;  %3094 = vst.msk [vmem:[#allocation3 + $0x51] sm:$0xff] %vm245_vm10, %v3085_v58  ;;  %v3088_v15 = vmax.f32 %v3080_v36, 0.0  ;;  %v3079_v56 = vadd.f32 %v3064_v54, %v2929_v35  ;;  %4996 = vmatmul.mubr.msk.f32.vlgmr.msra.gmra.mxu1 %vm245_vm10, %v3106_v4 }
 0x1dc   : > { %5010 = vmatmul.mubr.msk.f32.vlgmr.msra.gmra.mxu0 %vm245_vm10, %v5975_v0  ;;  %5022 = vmatpush3.msra.mxu1 %v6260_v2  ;;  %v6007_v7 = vld [vmem:[#allocation3 + $0x40] sm:$0xff]  ;;  %v3399_v40 = vld [vmem:[#allocation3 + $0x12] sm:$0xff] }
 0x1dd   : > { %4998 = vmatprep.mubr.msk.f32.mxu1 %vm245_vm10, %v5981_v12  ;;  %3097 = vst.msk [vmem:[#allocation3 + $0x81] sm:$0xff] %vm245_vm10, %v3088_v15  ;;  %v3087_v59 = vmax.f32 %v3079_v56, 0.0  ;;  %5012 = vmatprep.mubr.msk.f32.mxu0 %vm245_vm10, %v5992_v8  ;;  %v6009_v16 = vld [vmem:[#allocation3 + $0x41] sm:$0xff] }
 0x1de   : > { %5036 = vmatpush3.msra.mxu0 %v6261_v9  ;;  %v5998_v3 = vld [vmem:[#allocation3 + $0x30] sm:$0xff]  ;;  %5049 = vmatprep.subr.mxu1 %v4653_v18  ;;  %v3402_v26 = vld [vmem:[#allocation3 + $0x42] sm:$0xff] }
 0x1df   : > { %v6000_v34 = vld [vmem:[#allocation3 + $0x31] sm:$0xff]  ;;  %5063 = vmatprep.subr.mxu0 %v4662_v6  ;;  %3096 = vst.msk [vmem:[#allocation3 + $0x71] sm:$0xff] %vm245_vm10, %v3087_v59  ;;  %4999 = vmatmul.mubr.msk.f32.gmra.mxu1 %vm245_vm10, %v5998_v3 }
 0x1e0   : > { %5013 = vmatmul.mubr.msk.f32.gmra.mxu0 %vm245_vm10, %v6000_v34  ;;  %5001 = vmatprep.mubr.msk.f32.mxu1 %vm245_vm10, %v6007_v7  ;;  %v6023_v11 = vld [vmem:[#allocation3 + $0x60] sm:$0xff]  ;;  %v3401_v42 = vld [vmem:[#allocation3 + $0x32] sm:$0xff] }
 0x1e1   : > { %5015 = vmatprep.mubr.msk.f32.mxu0 %vm245_vm10, %v6009_v16  ;;  %v6025_v37 = vld [vmem:[#allocation3 + $0x61] sm:$0xff] }
 0x1e2   : > { %v6015_v21 = vld [vmem:[#allocation3 + $0x50] sm:$0xff]  ;;  %v3404_v63 = vld [vmem:[#allocation3 + $0x62] sm:$0xff] }
 0x1e3   : > { %v6017_v60 = vld [vmem:[#allocation3 + $0x51] sm:$0xff]  ;;  %5002 = vmatmul.mubr.msk.f32.gmra.mxu1 %vm245_vm10, %v6015_v21 }
 0x1e4   : > { %5016 = vmatmul.mubr.msk.f32.gmra.mxu0 %vm245_vm10, %v6017_v60  ;;  %5004 = vmatprep.mubr.msk.f32.mxu1 %vm245_vm10, %v6023_v11  ;;  %v3403_v22 = vld [vmem:[#allocation3 + $0x52] sm:$0xff]  ;;  %v3552_v20 = vld [vmem:[#allocation3 + $0x80] sm:$0xff] }
 0x1e5   : > { %5018 = vmatprep.mubr.msk.f32.mxu0 %vm245_vm10, %v6025_v37  ;;  %v3699_v33 = vld [vmem:[#allocation3 + $0x81] sm:$0xff] }
 0x1e6   : > { %v6031_v24 = vld [vmem:[#allocation3 + $0x70] sm:$0xff]  ;;  %v3846_v30 = vld [vmem:[#allocation3 + $0x82] sm:$0xff] }
 0x1e7   : > { %v6033_v19 = vld [vmem:[#allocation3 + $0x71] sm:$0xff]  ;;  %5005 = vmatmul.mubr.msk.f32.gmra.mxu1 %vm245_vm10, %v6031_v24 }
 0x1e8   : > { %5019 = vmatmul.mubr.msk.f32.gmra.mxu0 %vm245_vm10, %v6033_v19  ;;  %5023 = vmatprep.mubr.msk.f32.mxu1 %vm245_vm10, %v3398_v10  ;;  %v3405_v44 = vld [vmem:[#allocation3 + $0x72] sm:$0xff] }
 0x1e9   : > { %5037 = vmatprep.mubr.msk.f32.mxu0 %vm245_vm10, %v3106_v4 }
 0x1eb   : > { %5024 = vmatmul.mubr.msk.f32.vlgmr.msra.gmra.mxu1 %vm245_vm10, %v3399_v40 }
 0x1ec   : > { %5038 = vmatmul.mubr.msk.f32.vlgmr.msra.gmra.mxu0 %vm245_vm10, %v5981_v12  ;;  %5050 = vmatpush3.msra.mxu1 %v4653_v18 }
 0x1ed   : > { %5026 = vmatprep.mubr.msk.f32.mxu1 %vm245_vm10, %v6044_v14  ;;  %5040 = vmatprep.mubr.msk.f32.mxu0 %vm245_vm10, %v5998_v3 }
 0x1ee   : > { %5064 = vmatpush3.msra.mxu0 %v4662_v6  ;;  %5077 = vmatprep.subr.mxu1 %v4671_v41 }
 0x1ef   : > { %5091 = vmatprep.subr.mxu0 %v4680_v13  ;;  %5027 = vmatmul.mubr.msk.f32.gmra.mxu1 %vm245_vm10, %v3401_v42 }
 0x1f0   : > { %5041 = vmatmul.mubr.msk.f32.gmra.mxu0 %vm245_vm10, %v6007_v7  ;;  %5029 = vmatprep.mubr.msk.f32.mxu1 %vm245_vm10, %v3402_v26 }
 0x1f1   : > { %5043 = vmatprep.mubr.msk.f32.mxu0 %vm245_vm10, %v6015_v21 }
 0x1f3   : > { %5030 = vmatmul.mubr.msk.f32.gmra.mxu1 %vm245_vm10, %v3403_v22 }
 0x1f4   : > { %5044 = vmatmul.mubr.msk.f32.gmra.mxu0 %vm245_vm10, %v6023_v11  ;;  %5032 = vmatprep.mubr.msk.f32.mxu1 %vm245_vm10, %v3404_v63 }
 0x1f5   : > { %5046 = vmatprep.mubr.msk.f32.mxu0 %vm245_vm10, %v6031_v24 }
 0x1f7   : > { %5033 = vmatmul.mubr.msk.f32.gmra.mxu1 %vm245_vm10, %v3405_v44 }
 0x1f8   : > { %5047 = vmatmul.mubr.msk.f32.gmra.mxu0 %vm245_vm10, %v3552_v20  ;;  %5051 = vmatprep.mubr.msk.f32.mxu1 %vm245_vm10, %v5975_v0 }
 0x1f9   : > { %5065 = vmatprep.mubr.msk.f32.mxu0 %vm245_vm10, %v3399_v40 }
 0x1fb   : > { %5052 = vmatmul.mubr.msk.f32.vlgmr.msra.gmra.mxu1 %vm245_vm10, %v5992_v8 }
 0x1fc   : > { %5066 = vmatmul.mubr.msk.f32.vlgmr.msra.gmra.mxu0 %vm245_vm10, %v6044_v14  ;;  %5078 = vmatpush3.msra.mxu1 %v4671_v41 }
 0x1fd   : > { %5054 = vmatprep.mubr.msk.f32.mxu1 %vm245_vm10, %v6000_v34  ;;  %5068 = vmatprep.mubr.msk.f32.mxu0 %vm245_vm10, %v3401_v42 }
 0x1fe   : > { %5092 = vmatpush3.msra.mxu0 %v4680_v13  ;;  %5105 = vmatprep.subr.mxu1 %v4689_v57 }
 0x1ff   : > { %5055 = vmatmul.mubr.msk.f32.gmra.mxu1 %vm245_vm10, %v6009_v16 }
 0x200   : > { %5069 = vmatmul.mubr.msk.f32.gmra.mxu0 %vm245_vm10, %v3402_v26  ;;  %5057 = vmatprep.mubr.msk.f32.mxu1 %vm245_vm10, %v6017_v60 }
 0x201   : > { %5071 = vmatprep.mubr.msk.f32.mxu0 %vm245_vm10, %v3403_v22 }
 0x203   : > { %5058 = vmatmul.mubr.msk.f32.gmra.mxu1 %vm245_vm10, %v6025_v37 }
 0x204   : > { %5072 = vmatmul.mubr.msk.f32.gmra.mxu0 %vm245_vm10, %v3404_v63  ;;  %5060 = vmatprep.mubr.msk.f32.mxu1 %vm245_vm10, %v6033_v19 }
 0x205   : > { %5074 = vmatprep.mubr.msk.f32.mxu0 %vm245_vm10, %v3405_v44 }
 0x207   : > { %5061 = vmatmul.mubr.msk.f32.gmra.mxu1 %vm245_vm10, %v3699_v33 }
 0x208   : > { %5075 = vmatmul.mubr.msk.f32.gmra.mxu0 %vm245_vm10, %v3846_v30  ;;  %5079 = vmatprep.mubr.msk.f32.mxu1 %vm245_vm10, %v5981_v12 }
 0x209   : > { %5093 = vmatprep.mubr.msk.f32.mxu0 %vm245_vm10, %v5992_v8 }
 0x20b   : > { %5080 = vmatmul.mubr.msk.f32.vlgmr.msra.gmra.mxu1 %vm245_vm10, %v5998_v3 }
 0x20c   : > { %5094 = vmatmul.mubr.msk.f32.vlgmr.msra.gmra.mxu0 %vm245_vm10, %v6000_v34  ;;  %5106 = vmatpush3.msra.mxu1 %v4689_v57  ;;  %v4617_v34 = vld [vmem:[%s6252_s4] ss:$0 sm:$0xff] }
 0x20d   : > { %5082 = vmatprep.mubr.msk.f32.mxu1 %vm245_vm10, %v6007_v7  ;;  %5096 = vmatprep.mubr.msk.f32.mxu0 %vm245_vm10, %v6009_v16 }
 0x20f   : > { %5083 = vmatmul.mubr.msk.f32.gmra.mxu1 %vm245_vm10, %v6015_v21 }
 0x210   : > { %5097 = vmatmul.mubr.msk.f32.gmra.mxu0 %vm245_vm10, %v6017_v60  ;;  %5085 = vmatprep.mubr.msk.f32.mxu1 %vm245_vm10, %v6023_v11 }
 0x211   : > { %5099 = vmatprep.mubr.msk.f32.mxu0 %vm245_vm10, %v6025_v37 }
 0x213   : > { %5086 = vmatmul.mubr.msk.f32.gmra.mxu1 %vm245_vm10, %v6031_v24 }
 0x214   : > { %5100 = vmatmul.mubr.msk.f32.gmra.mxu0 %vm245_vm10, %v6033_v19  ;;  %5088 = vmatprep.mubr.msk.f32.mxu1 %vm245_vm10, %v3552_v20 }
 0x215   : > { %5102 = vmatprep.mubr.msk.f32.mxu0 %vm245_vm10, %v3699_v33 }
 0x217   : > { %5089 = vmatmul.mubr.msk.f32.gmra.mxu1 %vm245_vm10, %v3994_v38 }
 0x218   : > { %5103 = vmatmul.mubr.msk.f32.gmra.mxu0 %vm245_vm10, %v4141_v32  ;;  %5107 = vmatprep.mubr.msk.f32.mxu1 %vm245_vm10, %v6044_v14 }
 0x21b   : > { %5108 = vmatmul.mubr.msk.f32.vlgmr.msra.gmra.mxu1 %vm245_vm10, %v3401_v42 }
 0x21c   : > { %5110 = vmatprep.mubr.msk.f32.mxu1 %vm245_vm10, %v3402_v26 }
 0x21f   : > { %5111 = vmatmul.mubr.msk.f32.gmra.mxu1 %vm245_vm10, %v3403_v22 }
 0x220   : > { %5113 = vmatprep.mubr.msk.f32.mxu1 %vm245_vm10, %v3404_v63 }
 0x223   : > { %5114 = vmatmul.mubr.msk.f32.gmra.mxu1 %vm245_vm10, %v3405_v44 }
 0x224   : > { %5116 = vmatprep.mubr.msk.f32.mxu1 %vm245_vm10, %v3846_v30 }
 0x227   : > { %5117 = vmatmul.mubr.msk.f32.gmra.mxu1 %vm245_vm10, %v4288_v45 }
 0x29b   : > { %v4997_v46 = vpop.f32.mrf.mxu1 }
 0x29c   : > { %v5011_v17 = vpop.f32.mrf.mxu0  ;;  %v3244_v11 = vadd.f32 %v4997_v46, %v4617_v34 }
 0x29d   : > { %v3204_v27 = vpop.f32.mrf.mxu1 }
 0x29e   : > { %v3351_v39 = vpop.f32.mrf.mxu0  ;;  %v3243_v24 = vadd.f32 %v4617_v34, %v3204_v27  ;;  %v3391_v14 = vadd.f32 %v5011_v17, %v3244_v11 }
 0x29f   : > { %v5000_v49 = vpop.f32.mrf.mxu1 }
 0x2a0   : > { %v5014_v23 = vpop.f32.mrf.mxu0  ;;  %v3246_v41 = vadd.f32 %v5000_v49, %v4617_v34  ;;  %v3390_v26 = vadd.f32 %v3351_v39, %v3243_v24 }
 0x2a1   : > { %v3214_v48 = vpop.f32.mrf.mxu1 }
 0x2a2   : > { %v3361_v43 = vpop.f32.mrf.mxu0  ;;  %v3245_v22 = vadd.f32 %v4617_v34, %v3214_v48  ;;  %v3393_v57 = vadd.f32 %v5014_v23, %v3246_v41 }
 0x2a3   : > { %v5003_v61 = vpop.f32.mrf.mxu1 }
 0x2a4   : > { %v5017_v31 = vpop.f32.mrf.mxu0  ;;  %v3248_v33 = vadd.f32 %v5003_v61, %v4617_v34  ;;  %v3392_v45 = vadd.f32 %v3361_v43, %v3245_v22 }
 0x2a5   : > { %v3224_v25 = vpop.f32.mrf.mxu1 }
 0x2a6   : > { %v3371_v28 = vpop.f32.mrf.mxu0  ;;  %v3247_v38 = vadd.f32 %v4617_v34, %v3224_v25  ;;  %v3395_v11 = vadd.f32 %v5017_v31, %v3248_v33 }
 0x2a7   : > { %v5006_v50 = vpop.f32.mrf.mxu1 }
 0x2a8   : > { %v6134_v53 = vpop.f32.mrf.mxu0  ;;  %v3394_v39 = vadd.f32 %v3371_v28, %v3247_v38 }
 0x2a9   : > { %v3234_v47 = vpop.f32.mrf.mxu1 }
 0x2aa   : > { %v6136_v1 = vpop.f32.mrf.mxu0  ;;  %v3249_v48 = vadd.f32 %v4617_v34, %v3234_v47 }
 0x2ab   : > { %v5025_v29 = vpop.f32.mrf.mxu1 }
 0x2ac   : > { %v5039_v55 = vpop.f32.mrf.mxu0  ;;  %v3538_v63 = vadd.f32 %v5025_v29, %v3391_v14  ;;  %v3396_v31 = vadd.f32 %v6136_v1, %v3249_v48 }
 0x2ad   : > { %v3498_v52 = vpop.f32.mrf.mxu1 }
 0x2ae   : > { %v3645_v51 = vpop.f32.mrf.mxu0  ;;  %v3537_v30 = vadd.f32 %v3498_v52, %v3390_v26  ;;  %v3685_v46 = vadd.f32 %v5039_v55, %v3538_v63 }
 0x2af   : > { %v5028_v62 = vpop.f32.mrf.mxu1 }
 0x2b0   : > { %v5042_v5 = vpop.f32.mrf.mxu0  ;;  %v3540_v27 = vadd.f32 %v5028_v62, %v3393_v57 }
 0x2b1   : > { %v3508_v35 = vpop.f32.mrf.mxu1 }
 0x2b2   : > { %v3655_v58 = vpop.f32.mrf.mxu0  ;;  %v3687_v24 = vadd.f32 %v5042_v5, %v3540_v27 }
 0x2b3   : > { %v5031_v36 = vpop.f32.mrf.mxu1 }
 0x2b4   : > { %v6138_v54 = vpop.f32.mrf.mxu0  ;;  %v3542_v14 = vadd.f32 %v5031_v36, %v3395_v11 }
 0x2b5   : > { %v3518_v4 = vpop.f32.mrf.mxu1 }
 0x2b6   : > { %v6140_v0 = vpop.f32.mrf.mxu0  ;;  %v3541_v25 = vadd.f32 %v3518_v4, %v3394_v39  ;;  %v3689_v28 = vadd.f32 %v6138_v54, %v3542_v14 }
 0x2b7   : > { %v5034_v15 = vpop.f32.mrf.mxu1 }
 0x2b8   : > { %v6142_v56 = vpop.f32.mrf.mxu0  ;;  %v3688_v36 = vadd.f32 %v6140_v0, %v3541_v25 }
 0x2b9   : > { %v6144_v12 = vpop.f32.mrf.mxu1 }
 0x2ba   : > { %v6146_v18 = vpop.f32.mrf.mxu0 }
 0x2bb   : > { %v5053_v6 = vpop.f32.mrf.mxu1 }
 0x2bc   : > { %v5067_v2 = vpop.f32.mrf.mxu0 }
 0x2bd   : > { %v3792_v8 = vpop.f32.mrf.mxu1 }
 0x2be   : > { %v3939_v59 = vpop.f32.mrf.mxu0 }
 0x2bf   : > { %v5056_v9 = vpop.f32.mrf.mxu1 }
 0x2c0   : > { %v5070_v3 = vpop.f32.mrf.mxu0  ;;  %v3834_v62 = vadd.f32 %v5056_v9, %v3687_v24 }
 0x2c1   : > { %v3802_v7 = vpop.f32.mrf.mxu1 }
 0x2c2   : > { %v6151_v16 = vpop.f32.mrf.mxu0 }
 0x2c3   : > { %v5059_v21 = vpop.f32.mrf.mxu1 }
 0x2c4   : > { %v6153_v60 = vpop.f32.mrf.mxu0 }
 0x2c5   : > { %v3812_v37 = vpop.f32.mrf.mxu1 }
 0x2c6   : > { %v6155_v10 = vpop.f32.mrf.mxu0 }
 0x2c7   : > { %6262 = vst [vmem:[#allocation7_spill] sm:$0xff] %v6155_v10  ;;  %v5062_v19 = vpop.f32.mrf.mxu1  ;;  %v3539_v10 = vadd.f32 %v3508_v35, %v3392_v45 }
 0x2c8   : > { %v6157_v40 = vpop.f32.mrf.mxu0 }
 0x2c9   : > { %6263 = vst [vmem:[#allocation8_spill] sm:$0xff] %v6157_v40  ;;  %v6159_v13 = vpop.f32.mrf.mxu1  ;;  %v3250_v40 = vadd.f32 %v5006_v50, %v4617_v34  ;;  %v3686_v55 = vadd.f32 %v3655_v58, %v3539_v10  ;;  %v3981_v58 = vadd.f32 %v5070_v3, %v3834_v62 }
 0x2ca   : > { %6264 = vst [vmem:[#allocation9_spill] sm:$0xff] %v6159_v13  ;;  %v6161_v42 = vpop.f32.mrf.mxu0  ;;  %v3684_v13 = vadd.f32 %v3645_v51, %v3537_v30 }
 0x2cb   : > { %6265 = vst [vmem:[#allocation10_spill] sm:$0xff] %v6161_v42  ;;  %v5081_v44 = vpop.f32.mrf.mxu1  ;;  %v3832_v42 = vadd.f32 %v5053_v6, %v3685_v46  ;;  %v3397_v61 = vadd.f32 %v6134_v53, %v3250_v40  ;;  %v3833_v6 = vadd.f32 %v3802_v7, %v3686_v55  ;;  %v3543_v53 = vadd.f32 %v6144_v12, %v3396_v31 }
 0x2cc   : > { %v5095_v20 = vpop.f32.mrf.mxu0  ;;  %v3831_v23 = vadd.f32 %v3792_v8, %v3684_v13 }
 0x2cd   : > { %v4087_v32 = vpop.f32.mrf.mxu1  ;;  %v3979_v50 = vadd.f32 %v5067_v2, %v3832_v42  ;;  %v3544_v51 = vadd.f32 %v5034_v15, %v3397_v61  ;;  %v3836_v2 = vadd.f32 %v5059_v21, %v3689_v28  ;;  %v3835_v15 = vadd.f32 %v3812_v37, %v3688_v36 }
 0x2ce   : > { %v4234_v17 = vpop.f32.mrf.mxu0  ;;  %v3978_v47 = vadd.f32 %v3939_v59, %v3831_v23  ;;  %v3980_v54 = vadd.f32 %v6151_v16, %v3833_v6  ;;  %v3690_v0 = vadd.f32 %v6146_v18, %v3543_v53  ;;  %v6266_v42 = vld [vmem:[#allocation7_spill] sm:$0xff] }
 0x2cf   : > { %v5084_v49 = vpop.f32.mrf.mxu1  ;;  %v4127_v5 = vadd.f32 %v5081_v44, %v3979_v50  ;;  %v3691_v1 = vadd.f32 %v6142_v56, %v3544_v51  ;;  %v3983_v41 = vadd.f32 %v6153_v60, %v3836_v2  ;;  %v3982_v56 = vadd.f32 %v6266_v42, %v3835_v15 }
 0x2d0   : > { %v5098_v52 = vpop.f32.mrf.mxu0  ;;  %v4126_v9 = vadd.f32 %v4087_v32, %v3978_v47  ;;  %v4129_v7 = vadd.f32 %v5084_v49, %v3981_v58  ;;  %v6268_v57 = vld [vmem:[#allocation8_spill] sm:$0xff] }
 0x2d1   : > { %v4097_v29 = vpop.f32.mrf.mxu1  ;;  %v4274_v59 = vadd.f32 %v5095_v20, %v4127_v5  ;;  %v3838_v10 = vadd.f32 %v5062_v19, %v3691_v1  ;;  %v6267_v37 = vld [vmem:[#allocation9_spill] sm:$0xff] }
 0x2d2   : > { %v4244_v4 = vpop.f32.mrf.mxu0  ;;  %v4273_v3 = vadd.f32 %v4234_v17, %v4126_v9  ;;  %v4128_v21 = vadd.f32 %v4097_v29, %v3980_v54  ;;  %v3837_v26 = vadd.f32 %v6267_v37, %v3690_v0  ;;  %v4276_v16 = vadd.f32 %v5098_v52, %v4129_v7  ;;  %v6269_v45 = vld [vmem:[#allocation10_spill] sm:$0xff] }
 0x2d3   : > { %v5087_v43 = vpop.f32.mrf.mxu1  ;;  %v3985_v33 = vadd.f32 %v6268_v57, %v3838_v10 }
 0x2d4   : > { %v5101_v12 = vpop.f32.mrf.mxu0  ;;  %v4131_v63 = vadd.f32 %v5087_v43, %v3983_v41  ;;  %v4275_v30 = vadd.f32 %v4244_v4, %v4128_v21  ;;  %v3984_v46 = vadd.f32 %v6269_v45, %v3837_v26 }
 0x2d5   : > { %v4107_v35 = vpop.f32.mrf.mxu1 }
 0x2d6   : > { %v4254_v18 = vpop.f32.mrf.mxu0  ;;  %v4130_v38 = vadd.f32 %v4107_v35, %v3982_v56  ;;  %v4278_v49 = vadd.f32 %v5101_v12, %v4131_v63 }
 0x2d7   : > { %v5090_v8 = vpop.f32.mrf.mxu1 }
 0x2d8   : > { %v5104_v27 = vpop.f32.mrf.mxu0  ;;  %v4133_v11 = vadd.f32 %v5090_v8, %v3985_v33  ;;  %v4277_v24 = vadd.f32 %v4254_v18, %v4130_v38 }
 0x2d9   : > { %v4117_v34 = vpop.f32.mrf.mxu1 }
 0x2da   : > { %v4132_v14 = vadd.f32 %v4117_v34, %v3984_v46  ;;  %v4264_v25 = vpop.f32.mrf.mxu0  ;;  %v4280_v43 = vadd.f32 %v5104_v27, %v4133_v11 }
 0x2db   : > { %v5109_v40 = vpop.f32.mrf.mxu1 }
 0x2dc   : > { %v4421_v13 = vadd.f32 %v5109_v40, %v4274_v59  ;;  %v4279_v31 = vadd.f32 %v4264_v25, %v4132_v14 }
 0x2dd   : > { %v4381_v22 = vpop.f32.mrf.mxu1 }
 0x2de   : > { %v4429_v44 = vmax.f32 %v4421_v13, 0.0  ;;  %v4420_v20 = vadd.f32 %v4381_v22, %v4273_v3 }
 0x2df   : > { %v5112_v19 = vpop.f32.mrf.mxu1 }
 0x2e0   : > { %4437 = vst.msk [vmem:[%s6178_s8 + $0x8] sm:$0xff] %vm245_vm10, %v4429_v44  ;;  %v4428_v60 = vmax.f32 %v4420_v20, 0.0  ;;  %v4423_v32 = vadd.f32 %v5112_v19, %v4276_v16 }
 0x2e1   : > { %v4391_v17 = vpop.f32.mrf.mxu1 }
 0x2e2   : > { %4436 = vst.msk [vmem:[%s6178_s8] sm:$0xff] %vm245_vm10, %v4428_v60  ;;  %v4431_v39 = vmax.f32 %v4423_v32, 0.0  ;;  %v4422_v48 = vadd.f32 %v4391_v17, %v4275_v30 }
 0x2e3   : > { %v5115_v29 = vpop.f32.mrf.mxu1 }
 0x2e4   : > { %4439 = vst.msk [vmem:[%s6178_s8 + $0x18] sm:$0xff] %vm245_vm10, %v4431_v39  ;;  %v4430_v23 = vmax.f32 %v4422_v48, 0.0  ;;  %v4425_v61 = vadd.f32 %v5115_v29, %v4278_v49 }
 0x2e5   : > { %v4401_v52 = vpop.f32.mrf.mxu1 }
 0x2e6   : > { %4438 = vst.msk [vmem:[%s6178_s8 + $0x10] sm:$0xff] %vm245_vm10, %v4430_v23  ;;  %v4433_v55 = vmax.f32 %v4425_v61, 0.0  ;;  %v4424_v50 = vadd.f32 %v4401_v52, %v4277_v24 }
 0x2e7   : > { %v5118_v62 = vpop.f32.mrf.mxu1 }
 0x2e8   : > { %4441 = vst.msk [vmem:[%s6178_s8 + $0x28] sm:$0xff] %vm245_vm10, %v4433_v55  ;;  %v4432_v51 = vmax.f32 %v4424_v50, 0.0  ;;  %v4427_v35 = vadd.f32 %v5118_v62, %v4280_v43 }
 0x2e9   : > { %v4411_v28 = vpop.f32.mrf.mxu1 }
 0x2ea   : > { %4440 = vst.msk [vmem:[%s6178_s8 + $0x20] sm:$0xff] %vm245_vm10, %v4432_v51  ;;  %v4435_v47 = vmax.f32 %v4427_v35, 0.0  ;;  %v4426_v6 = vadd.f32 %v4411_v28, %v4279_v31 }
 0x2ec   : > { %4443 = vst.msk [vmem:[%s6178_s8 + $0x38] sm:$0xff] %vm245_vm10, %v4435_v47  ;;  %v4434_v5 = vmax.f32 %v4426_v6, 0.0 }
 0x2ee   : > { %4442 = vst.msk [vmem:[%s6178_s8 + $0x30] sm:$0xff] %vm245_vm10, %v4434_v5 }
 0x2ef   : > { %5209 = shalt.err (!%p5206_p3)
}
 0x2f0   : > { %s5210_s23 = scalar_lea.hbm %s6198_s13, 1024  ;;  %s5214_s30 = scalar_lea.hbm %s6253_s5, 2048 }
 0x2f1   : > { %p5211_p4 = scmp.ne.s32.totalorder %s6198_s13, %s5210_s23  ;;  %p5215_p9 = scmp.lt.s32.totalorder %s6198_s13, %s6253_s5 }
 0x2f2   : > { %p5216_p10 = scmp.lt.s32.totalorder %s5214_s30, %s5210_s23 }
 0x2f3   : > { %p5212_p7 = pnand %p5211_p4, %p5331_p5 }
 0x2f4   : > { %p5217_p11 = por %p5216_p10, %p5215_p9 }
 0x2f5   : > { %p5213_p8 = pneg %p5212_p7 }
 0x2f7   : > { %p5218_p12 = pnand %p5217_p11, %p5213_p8 }
 0x2f9   : > { %5221 = shalt.err (!%p5218_p12)
}
 0x2fa   : > { %s5261_s8 = smov 128   ;;  %s5262_s9 = smov 8  }
 0x2fb   : > { %5119 = dma.vmem_to_hbm [thread:$0]  (%p5331_p5), %s6200_s10, 1024, %s6198_s13, %s6208_s22, %s5261_s8, %s5261_s8, %s5262_s9  }
 0x2fc PF: > { %p5125_p13 = scmp.ge.s32.totalorder %s5256_s21, 2  ;;  %s4473_s11 = sand.u32 1, %s5244_s18  }
 0x2fd   : > { %s4474_s12 = scalar_lea.sflag [#allocation5], %s4473_s11 }
 0x2fe   : > { %p5122_p0 = pnand %p5125_p13, %p5335_p6 }
 0x300   : > { %p5123_p1 = pneg %p5122_p0 }
 0x302   : > { %5239 = dma.done.wait (%p5123_p1), %s4474_s12, 1024  }
 0x303   : > { %5241 = vsyncadd (%p5123_p1), %s4474_s12, 4294966272  ;;  %p15_p2 = scmp.ge.s32.totalorder %s5318_s24, 4   ;;  %s6270_s18 = smov %s5248_s19 }
 0x304   : > { %s6271_s19 = smov %s5252_s20  ;;  %s6272_s20 = smov %s5329_s27 }
 0x305   : > { %s6273_s21 = smov %s5318_s24  ;;  %17 = sbr.rel (!%p15_p2) target bundleno = 3 (0x3), region = 95 }
 0x30a   :  { %4479 = vsyncpa [#allocation5], 1 }
 0x30b   :  { %4481 = vsyncpa [#allocation5 + $0x1], 1 }

</bundles_post_ra>
